<compile_context>
chip_gen: v7x
topology: tpu7x:2x2x1
jax: 0.10.0
libtpu: 0.0.40
codegen_flags: <defaults>
</compile_context>

<pallas_src>
import functools
import math

import jax
import jax.numpy as jnp
from jax.experimental import pallas as pl
from jax.experimental.pallas import tpu as pltpu


# ----------------------------------------------------------------------------
# Config (mirrors the fields DeepseekV3MoE / MoEGate read)
# ----------------------------------------------------------------------------
class Config:
    hidden_size = 128
    intermediate_size = 256           # dense MLP size (unused by MoE path)
    moe_intermediate_size = 128
    n_routed_experts = 8
    num_experts_per_tok = 2
    n_group = 4
    topk_group = 2
    n_shared_experts = 2
    routed_scaling_factor = 2.5
    scoring_func = "sigmoid"
    seq_aux = True
    topk_method = "noaux_tc"
    norm_topk_prob = True
    hidden_act = "silu"


def _round_up(x, m):
    return ((x + m - 1) // m) * m


# ----------------------------------------------------------------------------
# Fused MoE kernel: shared experts + compressed-slot routed experts
# ----------------------------------------------------------------------------
def moe_fused_kernel(cnt_ref, eid_ref,              # SMEM (prefetched, 1D int32)
                     x_ref,                          # (tT, H)   bf16
                     gw_ref,                         # (tT, E)   f32 routing slab (this tile)
                     wg_ref, wu_ref, wd_ref,         # (H,I) (H,I) (I,H) bf16, current expert
                     shg_ref, shu_ref, shd_ref,      # (H,SI) (H,SI) (SI,H) bf16 shared
                     o_ref,                          # (tT, H)   out dtype
                     acc_ref):                       # VMEM (tT, H) f32 scratch
    t = pl.program_id(0)
    j = pl.program_id(1)
    n_slots = pl.num_programs(1)

    # Slot 0: initialize accumulator with the shared-experts MLP output.
    # TODO(synk): at real SI split this into its own dense GEMM (frees resident
    # VMEM on v7x and shortens the long first iteration per tile).
    @pl.when(j == 0)
    def _():
        x = x_ref[...]
        g = jnp.dot(x, shg_ref[...], preferred_element_type=jnp.float32)
        u = jnp.dot(x, shu_ref[...], preferred_element_type=jnp.float32)
        h = (jax.nn.silu(g) * u).astype(x.dtype)
        acc_ref[...] = jnp.dot(h, shd_ref[...], preferred_element_type=jnp.float32)

    # Active expert slot j (inactive slots repeat the previous expert id, so
    # their weight DMA is elided by the pipeline and compute is skipped here).
    @pl.when(j < cnt_ref[t])
    def _():
        x = x_ref[...]
        e = eid_ref[t * n_slots + j]                 # SMEM scalar: expert id of this slot
        g = jnp.dot(x, wg_ref[...], preferred_element_type=jnp.float32)
        u = jnp.dot(x, wu_ref[...], preferred_element_type=jnp.float32)
        h = (jax.nn.silu(g) * u).astype(x.dtype)     # (tT, I) bf16
        y = jnp.dot(h, wd_ref[...], preferred_element_type=jnp.float32)   # (tT, H) f32
        # Extract this expert's routing column from the per-tile slab
        # (select + lane reduce -> XLU slot, free next to the MXU work).
        col = jax.lax.broadcasted_iota(jnp.int32, gw_ref.shape, 1)
        w_tok = jnp.sum(jnp.where(col == e, gw_ref[...], 0.0),
                        axis=1, keepdims=True)       # (tT, 1) f32
        # Scale AFTER down_proj in f32 (matches torch: out.type(f32) * weight).
        acc_ref[...] += w_tok * y

    @pl.when(j == n_slots - 1)
    def _():
        o_ref[...] = acc_ref[...].astype(o_ref.dtype)


# ----------------------------------------------------------------------------
# Gate top-k / group selection (tiny glue, plain JAX — mirrors MoEGate.forward)
# ----------------------------------------------------------------------------
def gate_topk(scores, bias, cfg):
    T, E = scores.shape
    n_group, topk_group, top_k = cfg.n_group, cfg.topk_group, cfg.num_experts_per_tok

    scores_for_choice = scores + bias[None, :]
    grp = scores_for_choice.reshape(T, n_group, E // n_group)
    top2, _ = jax.lax.top_k(grp, 2)
    group_scores = top2.sum(axis=-1)                                  # (T, n_group)
    _, group_idx = jax.lax.top_k(group_scores, topk_group)            # (T, topk_group)
    group_mask = jax.nn.one_hot(group_idx, n_group, dtype=scores.dtype).sum(axis=1)
    score_mask = jnp.repeat(group_mask, E // n_group, axis=-1)        # (T, E)
    tmp_scores = jnp.where(score_mask > 0, scores_for_choice, 0.0)
    _, topk_idx = jax.lax.top_k(tmp_scores, top_k)                    # (T, top_k)
    topk_weight = jnp.take_along_axis(scores, topk_idx, axis=1)

    if top_k > 1 and cfg.norm_topk_prob:
        topk_weight = topk_weight / (topk_weight.sum(axis=-1, keepdims=True) + 1e-20)
    topk_weight = topk_weight * cfg.routed_scaling_factor

    # Dense (T, E) routing matrix (scatter of the top-k weights).
    w_dense = (jax.nn.one_hot(topk_idx, E, dtype=topk_weight.dtype)
               * topk_weight[..., None]).sum(axis=1)
    return topk_idx, topk_weight, w_dense


# ----------------------------------------------------------------------------
# Full module forward
# ----------------------------------------------------------------------------
def deepseek_v3_moe_forward(hidden_states, params, cfg, token_tile=256):
    B, S, H = hidden_states.shape
    T = B * S
    x_flat = hidden_states.reshape(T, H)

    E = cfg.n_routed_experts
    I = cfg.moe_intermediate_size
    SI = cfg.moe_intermediate_size * cfg.n_shared_experts
    top_k = cfg.num_experts_per_tok

    # --- MoE gate: tiny (H x E) matmul + sigmoid + grouped top-k, plain JAX ---
    scores = jax.nn.sigmoid(x_flat.astype(jnp.float32) @ params["gate_w_t"])
    topk_idx, _, w_dense = gate_topk(scores, params["gate_bias"], cfg)

    # --- token tiling (bf16 sublane packing needs tT % 16 == 0) ---
    assert token_tile % 16 == 0, "token_tile must be a multiple of 16 (bf16 vregs)"
    tT = min(token_tile, _round_up(T, 16))
    num_tiles = pl.cdiv(T, tT)
    T_pad = num_tiles * tT

    tok_hits = jax.nn.one_hot(topk_idx, E, dtype=jnp.int32).sum(axis=1)      # (T, E)
    w_dense = w_dense.astype(jnp.float32)
    if T_pad != T:
        pad = T_pad - T
        x_flat = jnp.pad(x_flat, ((0, pad), (0, 0)))
        w_dense = jnp.pad(w_dense, ((0, pad), (0, 0)))                        # zero weight
        tok_hits = jnp.pad(tok_hits, ((0, pad), (0, 0)))                      # inactive

    # --- per-tile compressed active-expert slot list (1D SMEM prefetch) ---
    max_slots = min(E, tT * top_k)                                            # static
    tile_hits = tok_hits.reshape(num_tiles, tT, E).sum(axis=1)                # (tiles, E)
    active = tile_hits > 0
    slot_cnt = active.sum(axis=-1).astype(jnp.int32)                          # (tiles,)
    order = jnp.argsort(jnp.where(active, 0, 1), axis=-1).astype(jnp.int32)[:, :max_slots]
    jj = jnp.arange(max_slots, dtype=jnp.int32)[None, :]
    last = jnp.take_along_axis(order, jnp.clip(slot_cnt - 1, 0, max_slots - 1)[:, None],
                               axis=1)
    # Inactive slots repeat the last active expert id -> index_map unchanged ->
    # the pipeline skips the weight re-fetch; compute skipped by pl.when.
    slot_eid = jnp.where(jj < slot_cnt[:, None], order, last).reshape(-1).astype(jnp.int32)

    # One lane-dense routing slab per token tile (fetched once per tile).
    w_slab = w_dense.reshape(num_tiles, tT, E)

    # Honest cost estimate: routed weights are streamed once per (tile, slot).
    flops = (2 * num_tiles * max_slots * tT * 3 * H * I
             + 2 * T_pad * 3 * H * SI)
    transcendentals = num_tiles * max_slots * tT * I + T_pad * SI
    bytes_accessed = (2 * T_pad * H * 2                        # x in + y out (bf16)
                      + num_tiles * max_slots * 3 * H * I * 2  # routed weights per tile
                      + 3 * H * SI * 2                         # shared weights (bf16)
                      + num_tiles * tT * E * 4                 # routing slabs (f32)
                      + 4 * (num_tiles + num_tiles * max_slots))
    ce = pl.CostEstimate(flops=flops, transcendentals=transcendentals,
                         bytes_accessed=bytes_accessed)

    def w_index(t, j, cnt, eid):                   # data-dependent expert-weight fetch
        return (eid[t * max_slots + j], 0, 0)

    out_flat = pl.pallas_call(
        moe_fused_kernel,
        out_shape=jax.ShapeDtypeStruct((T_pad, H), hidden_states.dtype),
        grid_spec=pltpu.PrefetchScalarGridSpec(
            num_scalar_prefetch=2,
            grid=(num_tiles, max_slots),
            in_specs=[
                pl.BlockSpec((tT, H),       lambda t, j, c, e: (t, 0)),      # x (per tile)
                pl.BlockSpec((None, tT, E), lambda t, j, c, e: (t, 0, 0)),   # routing slab
                pl.BlockSpec((None, H, I),  w_index),                        # exp gate W
                pl.BlockSpec((None, H, I),  w_index),                        # exp up   W
                pl.BlockSpec((None, I, H),  w_index),                        # exp down W
                pl.BlockSpec((H, SI),       lambda t, j, c, e: (0, 0)),      # shared gate
                pl.BlockSpec((H, SI),       lambda t, j, c, e: (0, 0)),      # shared up
                pl.BlockSpec((SI, H),       lambda t, j, c, e: (0, 0)),      # shared down
            ],
            out_specs=pl.BlockSpec((tT, H), lambda t, j, c, e: (t, 0)),
            scratch_shapes=[pltpu.VMEM((tT, H), jnp.float32)],
        ),
        compiler_params=pltpu.CompilerParams(
            dimension_semantics=("parallel", "arbitrary"),
            vmem_limit_bytes=48 * 1024 * 1024),
        cost_estimate=ce,
    )(slot_cnt, slot_eid, x_flat, w_slab,
      params["exp_wg"], params["exp_wu"], params["exp_wd"],
      params["sh_wg"], params["sh_wu"], params["sh_wd"])

    return out_flat[:T].reshape(B, S, H)


# ----------------------------------------------------------------------------
# Pure-JAX reference with identical numerics (bf16 inputs, f32 accumulation,
# routing weight applied after down_proj like the PyTorch module)
# ----------------------------------------------------------------------------
def reference_forward(hidden_states, params, cfg):
    B, S, H = hidden_states.shape
    x = hidden_states.reshape(-1, H)
    scores = jax.nn.sigmoid(x.astype(jnp.float32) @ params["gate_w_t"])
    _, _, w_dense = gate_topk(scores, params["gate_bias"], cfg)
    w_dense = w_dense.astype(jnp.float32)

    g = jnp.dot(x, params["sh_wg"], preferred_element_type=jnp.float32)
    u = jnp.dot(x, params["sh_wu"], preferred_element_type=jnp.float32)
    acc = jnp.dot((jax.nn.silu(g) * u).astype(x.dtype), params["sh_wd"],
                  preferred_element_type=jnp.float32)

    for e in range(cfg.n_routed_experts):
        g = jnp.dot(x, params["exp_wg"][e], preferred_element_type=jnp.float32)
        u = jnp.dot(x, params["exp_wu"][e], preferred_element_type=jnp.float32)
        h = (jax.nn.silu(g) * u).astype(x.dtype)
        y = jnp.dot(h, params["exp_wd"][e], preferred_element_type=jnp.float32)
        acc = acc + w_dense[:, e:e + 1] * y

    return acc.astype(hidden_states.dtype).reshape(B, S, H)


# ----------------------------------------------------------------------------
# Deterministic parameter init (weights stored (in, out); bf16 for MXU)
# ----------------------------------------------------------------------------
def init_params(cfg, key):
    H, I, E = cfg.hidden_size, cfg.moe_intermediate_size, cfg.n_routed_experts
    SI = cfg.moe_intermediate_size * cfg.n_shared_experts
    ks = jax.random.split(key, 8)

    def uinit(k, shape, fan_in, dtype=jnp.bfloat16):
        bound = 1.0 / math.sqrt(fan_in)
        return jax.random.uniform(k, shape, jnp.float32, -bound, bound).astype(dtype)

    return {
        # gate: nn.Linear-style weight (E, H) stored transposed -> (H, E), f32
        "gate_w_t": uinit(ks[0], (H, E), H, jnp.float32),
        "gate_bias": jax.random.normal(ks[1], (E,), jnp.float32) * 0.01,
        # routed experts: (E, in, out) bf16
        "exp_wg": uinit(ks[2], (E, H, I), H),
        "exp_wu": uinit(ks[3], (E, H, I), H),
        "exp_wd": uinit(ks[4], (E, I, H), I),
        # shared experts (one fused MLP with intermediate = I * n_shared) bf16
        "sh_wg": uinit(ks[5], (H, SI), H),
        "sh_wu": uinit(ks[6], (H, SI), H),
        "sh_wd": uinit(ks[7], (SI, H), SI),
    }


if __name__ == "__main__":
    cfg = Config()
    key = jax.random.PRNGKey(0)
    k_x, k_p = jax.random.split(key)

    # Small but lane-dense / MXU-friendly: H=128, I=128, T=256 -> 2 token tiles
    # (so the "parallel" token axis can shard across v7x's two TensorCores).
    B, S, H = 4, 64, cfg.hidden_size
    hidden_states = jax.random.normal(k_x, (B, S, H), jnp.float32).astype(jnp.bfloat16)
    params = init_params(cfg, k_p)

    fwd = jax.jit(functools.partial(deepseek_v3_moe_forward, cfg=cfg, token_tile=128))
    out = jax.block_until_ready(fwd(hidden_states, params))

    ref = jax.block_until_ready(reference_forward(hidden_states, params, cfg))
    assert out.shape == (B, S, H)
    err = float(jnp.max(jnp.abs(out.astype(jnp.float32) - ref.astype(jnp.float32))))
    assert err < 3e-2, f"max abs err {err}"

    print("KERNEL_OK")
</pallas_src>

<mosaic_0001>
module attributes {stable_mosaic.version = 11 : i64} {
  func.func @moe_fused_kernel(%arg0: i32, %arg1: i32, %arg2: memref<2xi32, #tpu.memory_space<smem>>, %arg3: memref<16xi32, #tpu.memory_space<smem>>, %arg4: memref<128x128xbf16, #tpu.memory_space<vmem>>, %arg5: memref<1x128x8xf32, #tpu.memory_space<vmem>>, %arg6: memref<1x128x128xbf16, #tpu.memory_space<vmem>>, %arg7: memref<1x128x128xbf16, #tpu.memory_space<vmem>>, %arg8: memref<1x128x128xbf16, #tpu.memory_space<vmem>>, %arg9: memref<128x256xbf16, #tpu.memory_space<vmem>>, %arg10: memref<128x256xbf16, #tpu.memory_space<vmem>>, %arg11: memref<256x128xbf16, #tpu.memory_space<vmem>>, %arg12: memref<128x128xbf16, #tpu.memory_space<vmem>>, %arg13: memref<128x128xf32, #tpu.memory_space<vmem>>) attributes {dimension_semantics = [#tpu.dimension_semantics<parallel>, #tpu.dimension_semantics<arbitrary>], iteration_bounds = array<i64: 2, 8>, scalar_prefetch = 2 : i64, scratch_operands = 1 : i64, tpu.core_type = #tpu.core_type<tc>, window_params = [{transform_indices = @transform_0, window_bounds = array<i64: 128, 128>}, {transform_indices = @transform_1, window_bounds = array<i64: 1, 128, 8>}, {transform_indices = @transform_2, window_bounds = array<i64: 1, 128, 128>}, {transform_indices = @transform_3, window_bounds = array<i64: 1, 128, 128>}, {transform_indices = @transform_4, window_bounds = array<i64: 1, 128, 128>}, {pipeline_mode = #tpu.pipeline_mode<synchronous>, transform_indices = @transform_5, window_bounds = array<i64: 128, 256>}, {pipeline_mode = #tpu.pipeline_mode<synchronous>, transform_indices = @transform_6, window_bounds = array<i64: 128, 256>}, {pipeline_mode = #tpu.pipeline_mode<synchronous>, transform_indices = @transform_7, window_bounds = array<i64: 256, 128>}, {transform_indices = @transform_8, window_bounds = array<i64: 128, 128>}]} {
    %c0_i32 = arith.constant 0 : i32
    %0 = arith.cmpi eq, %arg1, %c0_i32 : i32
    %1 = arith.extui %0 : i1 to i32
    %c0_i32_0 = arith.constant 0 : i32
    %2 = arith.cmpi ne, %1, %c0_i32_0 : i32
    scf.if %2 {
      %c0 = arith.constant 0 : index
      %c0_3 = arith.constant 0 : index
      %11 = vector.load %arg4[%c0, %c0_3] : memref<128x128xbf16, #tpu.memory_space<vmem>>, vector<128x128xbf16>
      %c0_4 = arith.constant 0 : index
      %c0_5 = arith.constant 0 : index
      %12 = vector.load %arg9[%c0_4, %c0_5] : memref<128x256xbf16, #tpu.memory_space<vmem>>, vector<128x256xbf16>
      %cst = arith.constant dense<0.000000e+00> : vector<128x256xf32>
      %13 = tpu.matmul %11, %12, %cst {dimension_numbers = #tpu.dot_dimension_numbers<[1], [0], [0], [1], [0, 0, 1, 1], [], []>} : vector<128x128xbf16>, vector<128x256xbf16>, vector<128x256xf32> -> vector<128x256xf32>
      %c0_6 = arith.constant 0 : index
      %c0_7 = arith.constant 0 : index
      %14 = vector.load %arg10[%c0_6, %c0_7] : memref<128x256xbf16, #tpu.memory_space<vmem>>, vector<128x256xbf16>
      %cst_8 = arith.constant dense<0.000000e+00> : vector<128x256xf32>
      %15 = tpu.matmul %11, %14, %cst_8 {dimension_numbers = #tpu.dot_dimension_numbers<[1], [0], [0], [1], [0, 0, 1, 1], [], []>} : vector<128x128xbf16>, vector<128x256xbf16>, vector<128x256xf32> -> vector<128x256xf32>
      %16 = arith.negf %13 : vector<128x256xf32>
      %17 = math.exp %16 : vector<128x256xf32>
      %cst_9 = arith.constant 1.000000e+00 : f32
      %18 = vector.broadcast %cst_9 : f32 to vector<128x256xf32>
      %19 = arith.addf %18, %17 : vector<128x256xf32>
      %20 = arith.divf %18, %19 : vector<128x256xf32>
      %21 = arith.mulf %13, %20 : vector<128x256xf32>
      %22 = arith.mulf %21, %15 : vector<128x256xf32>
      %23 = arith.truncf %22 : vector<128x256xf32> to vector<128x256xbf16>
      %c0_10 = arith.constant 0 : index
      %c0_11 = arith.constant 0 : index
      %24 = vector.load %arg11[%c0_10, %c0_11] : memref<256x128xbf16, #tpu.memory_space<vmem>>, vector<256x128xbf16>
      %cst_12 = arith.constant dense<0.000000e+00> : vector<128x128xf32>
      %25 = tpu.matmul %23, %24, %cst_12 {dimension_numbers = #tpu.dot_dimension_numbers<[1], [0], [0], [1], [0, 0, 1, 1], [], []>} : vector<128x256xbf16>, vector<256x128xbf16>, vector<128x128xf32> -> vector<128x128xf32>
      %c0_13 = arith.constant 0 : index
      %c0_14 = arith.constant 0 : index
      %26 = vector.load %arg13[%c0_13, %c0_14] : memref<128x128xf32, #tpu.memory_space<vmem>>, vector<128x128xf32>
      tpu.vector_store %arg13[%c0_13, %c0_14], %25 {strides = array<i32>} : memref<128x128xf32, #tpu.memory_space<vmem>>, vector<128x128xf32>,
    } else {
    }
    %3 = arith.index_cast %arg0 : i32 to index
    %4 = memref.load %arg2[%3] : memref<2xi32, #tpu.memory_space<smem>>
    %5 = arith.cmpi slt, %arg1, %4 : i32
    %6 = arith.extui %5 : i1 to i32
    %c0_i32_1 = arith.constant 0 : i32
    %7 = arith.cmpi ne, %6, %c0_i32_1 : i32
    scf.if %7 {
      %c0 = arith.constant 0 : index
      %c0_3 = arith.constant 0 : index
      %11 = vector.load %arg4[%c0, %c0_3] : memref<128x128xbf16, #tpu.memory_space<vmem>>, vector<128x128xbf16>
      %c8_i32 = arith.constant 8 : i32
      %12 = arith.muli %arg0, %c8_i32 : i32
      %13 = arith.addi %12, %arg1 : i32
      %14 = arith.index_cast %13 : i32 to index
      %15 = memref.load %arg3[%14] : memref<16xi32, #tpu.memory_space<smem>>
      %c0_4 = arith.constant 0 : index
      %c0_5 = arith.constant 0 : index
      %c0_6 = arith.constant 0 : index
      %16 = vector.load %arg6[%c0_4, %c0_5, %c0_6] : memref<1x128x128xbf16, #tpu.memory_space<vmem>>, vector<1x128x128xbf16>
      %17 = vector.shape_cast %16 : vector<1x128x128xbf16> to vector<128x128xbf16>
      %cst = arith.constant dense<0.000000e+00> : vector<128x128xf32>
      %18 = tpu.matmul %11, %17, %cst {dimension_numbers = #tpu.dot_dimension_numbers<[1], [0], [0], [1], [0, 0, 1, 1], [], []>} : vector<128x128xbf16>, vector<128x128xbf16>, vector<128x128xf32> -> vector<128x128xf32>
      %c0_7 = arith.constant 0 : index
      %c0_8 = arith.constant 0 : index
      %c0_9 = arith.constant 0 : index
      %19 = vector.load %arg7[%c0_7, %c0_8, %c0_9] : memref<1x128x128xbf16, #tpu.memory_space<vmem>>, vector<1x128x128xbf16>
      %20 = vector.shape_cast %19 : vector<1x128x128xbf16> to vector<128x128xbf16>
      %cst_10 = arith.constant dense<0.000000e+00> : vector<128x128xf32>
      %21 = tpu.matmul %11, %20, %cst_10 {dimension_numbers = #tpu.dot_dimension_numbers<[1], [0], [0], [1], [0, 0, 1, 1], [], []>} : vector<128x128xbf16>, vector<128x128xbf16>, vector<128x128xf32> -> vector<128x128xf32>
      %22 = arith.negf %18 : vector<128x128xf32>
      %23 = math.exp %22 : vector<128x128xf32>
      %cst_11 = arith.constant 1.000000e+00 : f32
      %24 = vector.broadcast %cst_11 : f32 to vector<128x128xf32>
      %25 = arith.addf %24, %23 : vector<128x128xf32>
      %26 = arith.divf %24, %25 : vector<128x128xf32>
      %27 = arith.mulf %18, %26 : vector<128x128xf32>
      %28 = arith.mulf %27, %21 : vector<128x128xf32>
      %29 = arith.truncf %28 : vector<128x128xf32> to vector<128x128xbf16>
      %c0_12 = arith.constant 0 : index
      %c0_13 = arith.constant 0 : index
      %c0_14 = arith.constant 0 : index
      %30 = vector.load %arg8[%c0_12, %c0_13, %c0_14] : memref<1x128x128xbf16, #tpu.memory_space<vmem>>, vector<1x128x128xbf16>
      %31 = vector.shape_cast %30 : vector<1x128x128xbf16> to vector<128x128xbf16>
      %cst_15 = arith.constant dense<0.000000e+00> : vector<128x128xf32>
      %32 = tpu.matmul %29, %31, %cst_15 {dimension_numbers = #tpu.dot_dimension_numbers<[1], [0], [0], [1], [0, 0, 1, 1], [], []>} : vector<128x128xbf16>, vector<128x128xbf16>, vector<128x128xf32> -> vector<128x128xf32>
      %33 = tpu.iota {dimensions = array<i32: 1>} : vector<128x8xi32>
      %34 = vector.broadcast %15 : i32 to vector<128x8xi32>
      %35 = arith.cmpi eq, %33, %34 : vector<128x8xi32>
      %c0_16 = arith.constant 0 : index
      %c0_17 = arith.constant 0 : index
      %c0_18 = arith.constant 0 : index
      %36 = vector.load %arg5[%c0_16, %c0_17, %c0_18] : memref<1x128x8xf32, #tpu.memory_space<vmem>>, vector<1x128x8xf32>
      %37 = vector.shape_cast %36 : vector<1x128x8xf32> to vector<128x8xf32>
      %cst_19 = arith.constant 0.000000e+00 : f32
      %38 = vector.broadcast %cst_19 : f32 to vector<128x8xf32>
      %39 = arith.select %35, %37, %38 : vector<128x8xi1>, vector<128x8xf32>
      %cst_20 = arith.constant dense<0.000000e+00> : vector<128xf32>
      %40 = vector.multi_reduction <add>, %39, %cst_20 [1] : vector<128x8xf32> to vector<128xf32>
      %41 = vector.shape_cast %40 : vector<128xf32> to vector<128x1xf32>
      %c0_21 = arith.constant 0 : index
      %c0_22 = arith.constant 0 : index
      %42 = vector.load %arg13[%c0_21, %c0_22] : memref<128x128xf32, #tpu.memory_space<vmem>>, vector<128x128xf32>
      %43 = vector.broadcast %41 : vector<128x1xf32> to vector<128x128xf32>
      %44 = arith.mulf %43, %32 : vector<128x128xf32>
      %45 = arith.addf %42, %44 : vector<128x128xf32>
      %c0_23 = arith.constant 0 : index
      %c0_24 = arith.constant 0 : index
      %46 = vector.load %arg13[%c0_23, %c0_24] : memref<128x128xf32, #tpu.memory_space<vmem>>, vector<128x128xf32>
      tpu.vector_store %arg13[%c0_23, %c0_24], %45 {strides = array<i32>} : memref<128x128xf32, #tpu.memory_space<vmem>>, vector<128x128xf32>,
    } else {
    }
    %c7_i32 = arith.constant 7 : i32
    %8 = arith.cmpi eq, %arg1, %c7_i32 : i32
    %9 = arith.extui %8 : i1 to i32
    %c0_i32_2 = arith.constant 0 : i32
    %10 = arith.cmpi ne, %9, %c0_i32_2 : i32
    scf.if %10 {
      %c0 = arith.constant 0 : index
      %c0_3 = arith.constant 0 : index
      %11 = vector.load %arg13[%c0, %c0_3] : memref<128x128xf32, #tpu.memory_space<vmem>>, vector<128x128xf32>
      %12 = arith.truncf %11 : vector<128x128xf32> to vector<128x128xbf16>
      %c0_4 = arith.constant 0 : index
      %c0_5 = arith.constant 0 : index
      %13 = vector.load %arg12[%c0_4, %c0_5] : memref<128x128xbf16, #tpu.memory_space<vmem>>, vector<128x128xbf16>
      tpu.vector_store %arg12[%c0_4, %c0_5], %12 {strides = array<i32>} : memref<128x128xbf16, #tpu.memory_space<vmem>>, vector<128x128xbf16>,
    } else {
    }
    return
  }
  func.func @transform_0(%arg0: i32, %arg1: i32, %arg2: memref<2xi32, #tpu.memory_space<smem>>, %arg3: memref<16xi32, #tpu.memory_space<smem>>) -> (i32, i32) {
    %c0_i32 = arith.constant 0 : i32
    %c0_i32_0 = arith.constant 0 : i32
    return %arg0, %c0_i32 : i32, i32
  }
  func.func @transform_1(%arg0: i32, %arg1: i32, %arg2: memref<2xi32, #tpu.memory_space<smem>>, %arg3: memref<16xi32, #tpu.memory_space<smem>>) -> (i32, i32, i32) {
    %c0_i32 = arith.constant 0 : i32
    %c0_i32_0 = arith.constant 0 : i32
    %c0_i32_1 = arith.constant 0 : i32
    return %arg0, %c0_i32, %c0_i32_0 : i32, i32, i32
  }
  func.func @transform_2(%arg0: i32, %arg1: i32, %arg2: memref<2xi32, #tpu.memory_space<smem>>, %arg3: memref<16xi32, #tpu.memory_space<smem>>) -> (i32, i32, i32) {
    %c8_i32 = arith.constant 8 : i32
    %0 = arith.muli %arg0, %c8_i32 : i32
    %1 = arith.addi %0, %arg1 : i32
    %2 = arith.index_cast %1 : i32 to index
    %3 = memref.load %arg3[%2] : memref<16xi32, #tpu.memory_space<smem>>
    %c0_i32 = arith.constant 0 : i32
    %c0_i32_0 = arith.constant 0 : i32
    %c0_i32_1 = arith.constant 0 : i32
    return %3, %c0_i32, %c0_i32_0 : i32, i32, i32
  }
  func.func @transform_3(%arg0: i32, %arg1: i32, %arg2: memref<2xi32, #tpu.memory_space<smem>>, %arg3: memref<16xi32, #tpu.memory_space<smem>>) -> (i32, i32, i32) {
    %c8_i32 = arith.constant 8 : i32
    %0 = arith.muli %arg0, %c8_i32 : i32
    %1 = arith.addi %0, %arg1 : i32
    %2 = arith.index_cast %1 : i32 to index
    %3 = memref.load %arg3[%2] : memref<16xi32, #tpu.memory_space<smem>>
    %c0_i32 = arith.constant 0 : i32
    %c0_i32_0 = arith.constant 0 : i32
    %c0_i32_1 = arith.constant 0 : i32
    return %3, %c0_i32, %c0_i32_0 : i32, i32, i32
  }
  func.func @transform_4(%arg0: i32, %arg1: i32, %arg2: memref<2xi32, #tpu.memory_space<smem>>, %arg3: memref<16xi32, #tpu.memory_space<smem>>) -> (i32, i32, i32) {
    %c8_i32 = arith.constant 8 : i32
    %0 = arith.muli %arg0, %c8_i32 : i32
    %1 = arith.addi %0, %arg1 : i32
    %2 = arith.index_cast %1 : i32 to index
    %3 = memref.load %arg3[%2] : memref<16xi32, #tpu.memory_space<smem>>
    %c0_i32 = arith.constant 0 : i32
    %c0_i32_0 = arith.constant 0 : i32
    %c0_i32_1 = arith.constant 0 : i32
    return %3, %c0_i32, %c0_i32_0 : i32, i32, i32
  }
  func.func @transform_5(%arg0: i32, %arg1: i32, %arg2: memref<2xi32, #tpu.memory_space<smem>>, %arg3: memref<16xi32, #tpu.memory_space<smem>>) -> (i32, i32) {
    %c0_i32 = arith.constant 0 : i32
    %c0_i32_0 = arith.constant 0 : i32
    %c0_i32_1 = arith.constant 0 : i32
    return %c0_i32, %c0_i32_0 : i32, i32
  }
  func.func @transform_6(%arg0: i32, %arg1: i32, %arg2: memref<2xi32, #tpu.memory_space<smem>>, %arg3: memref<16xi32, #tpu.memory_space<smem>>) -> (i32, i32) {
    %c0_i32 = arith.constant 0 : i32
    %c0_i32_0 = arith.constant 0 : i32
    %c0_i32_1 = arith.constant 0 : i32
    return %c0_i32, %c0_i32_0 : i32, i32
  }
  func.func @transform_7(%arg0: i32, %arg1: i32, %arg2: memref<2xi32, #tpu.memory_space<smem>>, %arg3: memref<16xi32, #tpu.memory_space<smem>>) -> (i32, i32) {
    %c0_i32 = arith.constant 0 : i32
    %c0_i32_0 = arith.constant 0 : i32
    %c0_i32_1 = arith.constant 0 : i32
    return %c0_i32, %c0_i32_0 : i32, i32
  }
  func.func @transform_8(%arg0: i32, %arg1: i32, %arg2: memref<2xi32, #tpu.memory_space<smem>>, %arg3: memref<16xi32, #tpu.memory_space<smem>>) -> (i32, i32) {
    %c0_i32 = arith.constant 0 : i32
    %c0_i32_0 = arith.constant 0 : i32
    return %arg0, %c0_i32 : i32, i32
  }
}

</mosaic_0001>

<bundles_post_ra>
// kernel: deepseek_v3_moe_forward.1
= control target key start
LH: loop header
LB: loop body
LE: loop exit
PB: predicated region body
PF: predicated region fallthrough
CT: control target
= control target key end

     0   :  { %s4361_s0 = inlined_call_operand.vmem [shape: s32[2], index: 0, kind: input, shape index: {}]   ;;  %s4362_s2 = inlined_call_operand.vmem [shape: bf16[256,128], index: 2, kind: input, shape index: {}]   ;;  %s4363_s3 = inlined_call_operand.vmem [shape: f32[2,128,8], index: 3, kind: input, shape index: {}]   ;;  %s4364_s4 = inlined_call_operand.vmem [shape: bf16[8,128,128], index: 4, kind: input, shape index: {}]   ;;  %s4365_s5 = inlined_call_operand.vmem [shape: bf16[8,128,128], index: 5, kind: input, shape index: {}]   ;;  %s4366_s6 = inlined_call_operand.vmem [shape: bf16[8,128,128], index: 6, kind: input, shape index: {}]   ;;  %s4367_s7 = inlined_call_operand.vmem [shape: bf16[128,256], index: 7, kind: input, shape index: {}]   ;;  %s4368_s8 = inlined_call_operand.vmem [shape: bf16[128,256], index: 8, kind: input, shape index: {}]   ;;  %s4369_s9 = inlined_call_operand.vmem [shape: bf16[256,128], index: 9, kind: input, shape index: {}]   ;;  %s4370_s10 = inlined_call_operand.hbm [shape: bf16[256,128], index: 10, kind: output, shape index: {}]   ;;  %s4371_s1 = inlined_call_operand.vmem [shape: s32[16], index: 1, kind: input, shape index: {}]  }
   0x1   :  { %4381 = sst [smem:[#allocation19_spill]] %s4362_s2  ;;  %s15_s15 = sshll.u32 %s4361_s0, 4  ;;  %s16_s15 = int_to_ptr.vmem [resolvable:$true] %s15_s15 }
   0x2   :  { %4382 = sst [smem:[#allocation20_spill]] %s4363_s3  ;;  %s19_s18 = sshll.u32 %s4371_s1, 4  ;;  %s20_s18 = int_to_ptr.vmem [resolvable:$true] %s19_s18 }
   0x3   :  { %s3415_s19 = scalar_lea.vmem %s16_s15, 16  ;;  %p3420_p1 = scmp.lt.s32.totalorder %s16_s15, %s16_s15 }
   0x4   :  { %p3416_p0 = scmp.ne.s32.totalorder %s16_s15, %s3415_s19  ;;  %p3421_p2 = scmp.lt.s32.totalorder %s3415_s19, %s3415_s19 }
   0x6   :  { %p3422_p3 = por %p3421_p2, %p3420_p1 }
   0x8   :  { %p3423_p4 = pnand %p3422_p3, %p3416_p0 }
   0xa   :  { %3426 = shalt.err (!%p3423_p4)  }
   0xb   :  { %s3537_s20 = smov [#allocation4]   ;;  %s3427_s21 = scalar_lea.vmem %s20_s18, 16 }
   0xc   :  { %18 = dma.vmem_to_smem %s16_s15, 16, %s3537_s20, [#allocation3] }
   0xd   :  { %p3428_p5 = scmp.ne.s32.totalorder %s20_s18, %s3427_s21  ;;  %p3432_p6 = scmp.lt.s32.totalorder %s20_s18, %s20_s18 }
   0xe   :  { %p3433_p7 = scmp.lt.s32.totalorder %s3427_s21, %s3427_s21 }
  0x10   :  { %p3434_p8 = por %p3433_p7, %p3432_p6 }
  0x12   :  { %p3435_p9 = pnand %p3434_p8, %p3428_p5 }
  0x14   :  { %3438 = shalt.err (!%p3435_p9)  }
  0x15   :  { %s3538_s0 = smov [#allocation5]  }
  0x16   :  { %22 = dma.vmem_to_smem %s20_s18, 16, %s3538_s0, [#allocation3] }
  0x17   :  { %3499 = dma.done.wait [#allocation3], 32 }
  0x18   :  { %3500 = vsyncadd [#allocation3], 4294967264 }
  0x19   :  { %24 = sfence }
  0x1a   :  { %25 = vsyncpa [#allocation7], 0 }
  0x1b   :  { %27 = vsyncpa [#allocation7 + $0x1], 0  ;;  %s3604_s1 = smov 0   ;;  %s3606_s22 = smov 0  }
  0x1c   :  { %s3608_s23 = smov 0   ;;  %s3610_s24 = smov 0  }
  0x1d   :  { %s3612_s25 = smov 0   ;;  %s3614_s26 = smov 0  }
  0x1e   :  { %s3616_s27 = smov 0   ;;  %s3618_s28 = smov 0  }
  0x1f LB: > { %4383 = sst [smem:[#allocation10_spill]] %s3507_s1  ;;  %s2549_s29 = sadd.s32 4294967295, %s3535_s28   ;;  %s3535_s28 = sphi %s3618_s28, %s33_s28   ;;  %s3531_s27 = sphi %s3616_s27, %s4407_s27   ;;  %s3527_s26 = sphi %s3614_s26, %s4410_s26   ;;  %s3523_s25 = sphi %s3612_s25, %s4405_s25   ;;  %s3519_s24 = sphi %s3610_s24, %s4404_s24   ;;  %s3515_s23 = sphi %s3608_s23, %s4403_s23   ;;  %s3511_s22 = sphi %s3606_s22, %s4409_s22   ;;  %s3507_s1 = sphi %s3604_s1, %s4408_s1  }
  0x20   : > { %4384 = sst [smem:[#allocation11_spill]] %s3515_s23  ;;  %s2550_s30 = sadd.s32 4294967294, %s3535_s28  }
  0x21   : > { %4385 = sst [smem:[#allocation12_spill]] %s3527_s26  ;;  %s42_s11 = sadd.s32 1, %s3527_s26 }
  0x22   : > { %4386 = sst [smem:[#allocation13_spill]] %s3531_s27  ;;  %p43_p10 = scmp.ge.s32.totalorder %s42_s11, 8 }
  0x23   : > { %4387 = sst [smem:[#allocation14_spill]] %s3535_s28  ;;  %s45_s12 = sadd.s32 1, %s3531_s27 }
  0x24   : > { %p273_p11 = scmp.ne.s32.totalorder %s3515_s23, %s3511_s22  ;;  %p274_p12 = scmp.eq.s32.totalorder %s2549_s29, 15 }
  0x25   : > { %s4412_s11 = smov (%p43_p10, %s42_s11), 0  ;;  %s4414_s12 = smov (!%p43_p10, %s45_s12), %s3531_s27 }
  0x26   : > { %4388 = sst [smem:[#allocation15_spill]] %s4412_s11  ;;  %p3653_p13 = por %p274_p12, %p273_p11 }
  0x27   : > { %p279_p0 = scmp.ne.s32.totalorder %s3511_s22, %s3507_s1  ;;  %p47_p1 = scmp.ge.s32.totalorder %s4414_s12, 2 }
  0x28   : > { %p280_p2 = scmp.eq.s32.totalorder %s2550_s30, 15  ;;  %p2559_p3 = scmp.ge.s32.totalorder %s3535_s28, 1 }
  0x29   : > { %p366_p4 = scmp.lt.s32.totalorder %s3535_s28, 17  ;;  %s4416_s12 = smov (%p47_p1, %s4414_s12), 0 }
  0x2a   : > { %4390 = sst [smem:[#allocation16_spill]] %s4416_s12  ;;  %p3663_p5 = por %p280_p2, %p279_p0 }
  0x2b   : > { %p367_p6 = pnand %p2559_p3, %p366_p4  ;;  %s260_s15 = ssub.s32 %s3531_s27, %s4416_s12 }
  0x2c   : > { %s4391_s14 = scalar_select %p3663_p5, 1, 0 }
  0x2d   : > { %s263_s16 = sadd.s32 1, %s3515_s23  ;;  %p261_p7 = scmp.eq.s32.totalorder %s260_s15, 0 }
  0x2e   : > { %4392 = sst [smem:[#allocation17_spill]] %s4391_s14  ;;  %370 = sbr.rel (%p367_p6) target bundleno = 1213 (0x4bd), region = 52 }
  0x2f   : > { %s3671_s17 = scalar_select %p261_p7, %s3515_s23, %s263_s16  }
  0x30   : > { %s4375_s18 = sand.u32 (!%p367_p6), 1, %s3511_s22   ;;  %s2561_s19 = sshll.u32 (!%p367_p6), %s3523_s25, 4 }
  0x31   : > { %4393 = sst [smem:[#allocation18_spill]] %s3671_s17  ;;  %s2560_s20 = sshll.u32 (!%p367_p6), %s4375_s18, 6 }
  0x32   : > { %p430_p8 = scmp.lt.s32.totalorder (!%p367_p6), %s2561_s19, 31  ;;  %p435_p9 = scmp.lt.s32.totalorder (!%p367_p6), %s3523_s25, 1 }
  0x33   : > { %s2565_s29 = sshll.u32 (!%p367_p6), %s3523_s25, 3  ;;  %s4394_s2 = sld [smem:[#allocation19_spill]] (!%p367_p6) }
  0x34   : > { %s4395_s3 = sld [smem:[#allocation20_spill]] (!%p367_p6)  ;;  %s3691_s17 = sadd.s32 (!%p367_p6), %s3519_s24, %s2565_s29 }
  0x35   : > { %s4418_s19 = smov (!%p430_p8, %s2561_s19), 31  ;;  %s442_s18 = sld [smem:[#allocation5 + %s3691_s17]] }
  0x36   : > { %s436_s21 = scalar_select %p435_p9, %s3523_s25, 1 }
  0x37   : > { %s2562_s0 = sshll.u32 %s4418_s19, 2  ;;  %s453_s23 = sld [smem:[#allocation5 + %s3691_s17]] }
  0x38   : > { %s2735_s12 = sshll.u32 %s436_s21, 7  ;;  %s464_s19 = sld [smem:[#allocation5 + %s3691_s17]] }
  0x39   : > { %s3683_s16 = scalar_lea.vmem %s4394_s2, %s2562_s0  ;;  %s3711_s28 = scalar_lea.vmem [#allocation6], %s2560_s20 }
  0x3a   : > { %s3688_s26 = scalar_lea.vmem %s4395_s3, %s2735_s12  ;;  %p2574_p0 = scmp.ne.s32.totalorder %s3519_s24, 0 }
  0x3b   : > { %p443_p10 = scmp.lt.s32.totalorder %s442_s18, 7  ;;  %v3119_v0 = vld [vmem:[%s4367_s7 + $0x4] ss:$8 sps:$4 sm:$0xff] (!%p2574_p0)   ;;  %v3121_v1 = vld [vmem:[%s4367_s7] ss:$8 sps:$4 sm:$0xff] (!%p2574_p0)   ;;  %v3539_v2 = vmov (!%p2574_p0), 0  }
  0x3c   : > { %478 = sbr.rel (%p2574_p0) target bundleno = 644 (0x284), region = 56  ;;  %671 = vmatprep.mubr.bf16.mxu0 (!%p2574_p0), %v3539_v2  ;;  %711 = vmatprep.mubr.bf16.mxu1 (!%p2574_p0), %v3539_v2  ;;  %v3122_v3 = vld [vmem:[%s4367_s7 + $0x14] ss:$8 sps:$4 sm:$0xff] (!%p2574_p0)   ;;  %v3124_v4 = vld [vmem:[%s4367_s7 + $0x10] ss:$8 sps:$4 sm:$0xff] (!%p2574_p0)   ;;  %v3143_v17 = vld [vmem:[%s3683_s16] sm:$0xff] (!%p2574_p0)  }
  0x3d   : > { %p454_p11 = scmp.lt.s32.totalorder %s453_s23, 7  ;;  %s4420_s18 = smov (!%p443_p10, %s442_s18), 7  ;;  %639 = vmatprep.subr.bf16.mxu0 (!%p2574_p0), %v3119_v0  ;;  %3011 = vmatprep.subr.bf16.mxu1 (!%p2574_p0), %v3119_v0  ;;  %v3125_v5 = vld [vmem:[%s4367_s7 + $0x24] ss:$8 sps:$4 sm:$0xff] (!%p2574_p0)   ;;  %v3127_v6 = vld [vmem:[%s4367_s7 + $0x20] ss:$8 sps:$4 sm:$0xff] (!%p2574_p0)  }
  0x3e   : > { %p465_p12 = scmp.lt.s32.totalorder %s464_s19, 7  ;;  %s2736_s0 = sshll.u32 %s4420_s18, 6  ;;  %640 = vmatpush1.bf16.msra.mxu0 (!%p2574_p0), %v3121_v1  ;;  %3019 = vmatpush1.bf16.msra.mxu1 (!%p2574_p0), %v3121_v1  ;;  %v3128_v7 = vld [vmem:[%s4367_s7 + $0x34] ss:$8 sps:$4 sm:$0xff] (!%p2574_p0)   ;;  %v3130_v8 = vld [vmem:[%s4367_s7 + $0x30] ss:$8 sps:$4 sm:$0xff] (!%p2574_p0)  }
  0x3f   : > { %s4422_s23 = smov (!%p454_p11, %s453_s23), 7  ;;  %s3699_s27 = scalar_lea.vmem %s4364_s4, %s2736_s0  ;;  %641 = vmatprep.subr.bf16.mxu0 (!%p2574_p0), %v3122_v3  ;;  %3012 = vmatprep.subr.bf16.mxu1 (!%p2574_p0), %v3122_v3  ;;  %v3131_v9 = vld [vmem:[%s4367_s7 + $0x44] ss:$8 sps:$4 sm:$0xff] (!%p2574_p0)   ;;  %v3133_v10 = vld [vmem:[%s4367_s7 + $0x40] ss:$8 sps:$4 sm:$0xff] (!%p2574_p0)   ;;  %v3159_v30 = vld [vmem:[%s3683_s16 + $0x10] sm:$0xff] (!%p2574_p0)  }
  0x40   : > { %s2737_s11 = sshll.u32 %s4422_s23, 6  ;;  %s4424_s19 = smov (!%p465_p12, %s464_s19), 7  ;;  %v3134_v11 = vld [vmem:[%s4367_s7 + $0x54] ss:$8 sps:$4 sm:$0xff] (!%p2574_p0)   ;;  %v3136_v12 = vld [vmem:[%s4367_s7 + $0x50] ss:$8 sps:$4 sm:$0xff] (!%p2574_p0)  }
  0x41   : > { %s3704_s15 = scalar_lea.vmem %s4365_s5, %s2737_s11  ;;  %s2738_s2 = sshll.u32 %s4424_s19, 6  ;;  %v3137_v13 = vld [vmem:[%s4367_s7 + $0x64] ss:$8 sps:$4 sm:$0xff] (!%p2574_p0)   ;;  %v3139_v14 = vld [vmem:[%s4367_s7 + $0x60] ss:$8 sps:$4 sm:$0xff] (!%p2574_p0)   ;;  %v3160_v31 = vld [vmem:[%s3683_s16 + $0x30] sm:$0xff] (!%p2574_p0)  }
  0x42   : > { %s3709_s1 = scalar_lea.vmem %s4366_s6, %s2738_s2  ;;  %642 = vmatpush1.bf16.msra.mxu0 (!%p2574_p0), %v3124_v4  ;;  %3020 = vmatpush1.bf16.msra.mxu1 (!%p2574_p0), %v3124_v4  ;;  %v3140_v15 = vld [vmem:[%s4367_s7 + $0x74] ss:$8 sps:$4 sm:$0xff] (!%p2574_p0)   ;;  %v3142_v16 = vld [vmem:[%s4367_s7 + $0x70] ss:$8 sps:$4 sm:$0xff] (!%p2574_p0)   ;;  %v3766_v18 = vld [vmem:[%s3683_s16 + $0x20] sm:$0xff] (!%p2574_p0)  }
  0x43   : > { %643 = vmatprep.subr.bf16.mxu0 %v3125_v5  ;;  %3013 = vmatprep.subr.bf16.mxu1 %v3125_v5  ;;  %v3147_v19 = vld [vmem:[%s4368_s8 + $0x4] ss:$8 sps:$4 sm:$0xff]   ;;  %v3145_v20 = vld [vmem:[%s4368_s8] ss:$8 sps:$4 sm:$0xff]   ;;  %v3150_v21 = vld [vmem:[%s4368_s8 + $0x14] ss:$8 sps:$4 sm:$0xff]  }
  0x44   : > { %v3148_v22 = vld [vmem:[%s4368_s8 + $0x10] ss:$8 sps:$4 sm:$0xff]   ;;  %v3155_v23 = vld [vmem:[%s4368_s8 + $0x24] ss:$8 sps:$4 sm:$0xff]   ;;  %v3153_v26 = vld [vmem:[%s4368_s8 + $0x20] ss:$8 sps:$4 sm:$0xff]  }
  0x45   : > { %v3151_v24 = vld [vmem:[%s3683_s16 + $0x8] sm:$0xff]   ;;  %v3158_v27 = vld [vmem:[%s4368_s8 + $0x34] ss:$8 sps:$4 sm:$0xff]   ;;  %v3156_v28 = vld [vmem:[%s4368_s8 + $0x30] ss:$8 sps:$4 sm:$0xff]  }
  0x46   : > { %644 = vmatpush1.bf16.msra.mxu0 %v3127_v6  ;;  %3021 = vmatpush1.bf16.msra.mxu1 %v3127_v6  ;;  %v3152_v25 = vld [vmem:[%s3683_s16 + $0x28] sm:$0xff]   ;;  %v3166_v33 = vld [vmem:[%s4368_s8 + $0x54] ss:$8 sps:$4 sm:$0xff]   ;;  %v3164_v34 = vld [vmem:[%s4368_s8 + $0x50] ss:$8 sps:$4 sm:$0xff]  }
  0x47   : > { %645 = vmatprep.subr.bf16.mxu0 %v3128_v7  ;;  %3014 = vmatprep.subr.bf16.mxu1 %v3128_v7  ;;  %v3163_v29 = vld [vmem:[%s4368_s8 + $0x44] ss:$8 sps:$4 sm:$0xff]   ;;  %v3161_v32 = vld [vmem:[%s4368_s8 + $0x40] ss:$8 sps:$4 sm:$0xff]   ;;  %v3167_v36 = vld [vmem:[%s3683_s16 + $0x18] sm:$0xff]  }
  0x48   : > { %v3171_v35 = vld [vmem:[%s4368_s8 + $0x64] ss:$8 sps:$4 sm:$0xff]   ;;  %v3168_v37 = vld [vmem:[%s3683_s16 + $0x38] sm:$0xff]   ;;  %v3169_v38 = vld [vmem:[%s4368_s8 + $0x60] ss:$8 sps:$4 sm:$0xff]  }
  0x49   : > { %v3174_v39 = vld [vmem:[%s4368_s8 + $0x74] ss:$8 sps:$4 sm:$0xff]   ;;  %v3172_v40 = vld [vmem:[%s4368_s8 + $0x70] ss:$8 sps:$4 sm:$0xff]   ;;  %v3175_v41 = vld [vmem:[%s4369_s9 + $0x40] sm:$0xff]  }
  0x4a   : > { %646 = vmatpush1.bf16.msra.mxu0 %v3130_v8  ;;  %3022 = vmatpush1.bf16.msra.mxu1 %v3130_v8  ;;  %v3176_v42 = vld [vmem:[%s4369_s9] sm:$0xff]   ;;  %v3177_v43 = vld [vmem:[%s4369_s9 + $0x48] sm:$0xff]   ;;  %v3179_v45 = vld [vmem:[%s4369_s9 + $0x50] sm:$0xff]  }
  0x4b   : > { %647 = vmatprep.subr.bf16.mxu0 %v3131_v9  ;;  %3015 = vmatprep.subr.bf16.mxu1 %v3131_v9  ;;  %v3178_v44 = vld [vmem:[%s4369_s9 + $0x8] sm:$0xff]   ;;  %v3180_v46 = vld [vmem:[%s4369_s9 + $0x10] sm:$0xff]   ;;  %v3181_v47 = vld [vmem:[%s4369_s9 + $0x58] sm:$0xff]  }
  0x4c   : > { %v3182_v48 = vld [vmem:[%s4369_s9 + $0x18] sm:$0xff]   ;;  %v3183_v49 = vld [vmem:[%s4369_s9 + $0x60] sm:$0xff]   ;;  %v3185_v51 = vld [vmem:[%s4369_s9 + $0x68] sm:$0xff]  }
  0x4d   : > { %v3184_v50 = vld [vmem:[%s4369_s9 + $0x20] sm:$0xff]   ;;  %v3186_v52 = vld [vmem:[%s4369_s9 + $0x28] sm:$0xff]   ;;  %v3187_v53 = vld [vmem:[%s4369_s9 + $0x70] sm:$0xff]  }
  0x4e   : > { %648 = vmatpush1.bf16.msra.mxu0 %v3133_v10  ;;  %3023 = vmatpush1.bf16.msra.mxu1 %v3133_v10  ;;  %v3188_v54 = vld [vmem:[%s4369_s9 + $0x30] sm:$0xff]   ;;  %v3189_v55 = vld [vmem:[%s4369_s9 + $0x78] sm:$0xff]  }
  0x4f   : > { %649 = vmatprep.subr.bf16.mxu0 %v3134_v11  ;;  %3016 = vmatprep.subr.bf16.mxu1 %v3134_v11  ;;  %v3190_v56 = vld [vmem:[%s4369_s9 + $0x38] sm:$0xff]  }
  0x52   : > { %650 = vmatpush1.bf16.msra.mxu0 %v3136_v12  ;;  %3024 = vmatpush1.bf16.msra.mxu1 %v3136_v12 }
  0x53   : > { %651 = vmatprep.subr.bf16.mxu0 %v3137_v13  ;;  %3017 = vmatprep.subr.bf16.mxu1 %v3137_v13 }
  0x56   : > { %652 = vmatpush1.bf16.msra.mxu0 %v3139_v14  ;;  %3025 = vmatpush1.bf16.msra.mxu1 %v3139_v14 }
  0x57   : > { %653 = vmatprep.subr.bf16.mxu0 %v3140_v15  ;;  %3018 = vmatprep.subr.bf16.mxu1 %v3140_v15 }
  0x5a   : > { %654 = vmatpush1.bf16.msra.mxu0 %v3142_v16  ;;  %3026 = vmatpush1.bf16.msra.mxu1 %v3142_v16 }
  0x5b   : > { %848 = vmatprep.subr.bf16.mxu1 %v3147_v19  ;;  %2803 = vmatprep.subr.bf16.mxu0 %v3175_v41 }
  0x5d   : > { %672 = vmatmul.mubr.bf16.vlgmr.msra.gmra.mrb[0].mxu0 %v3143_v17  ;;  %712 = vmatmul.mubr.bf16.vlgmr.msra.gmra.mrb[0].mxu1 %v3766_v18 }
  0x5e   : > { %849 = vmatpush1.bf16.msra.mxu1 %v3145_v20  ;;  %681 = vmatprep.mubr.bf16.mxu0 %v3539_v2 }
  0x5f   : > { %850 = vmatprep.subr.bf16.mxu1 %v3150_v21  ;;  %721 = vmatprep.mubr.bf16.mxu1 %v3539_v2 }
  0x60   : > { %2804 = vmatpush3.bf16.msra.mxu0 %v3176_v42 }
  0x61   : > { %2805 = vmatprep.subr.bf16.mxu0 %v3177_v43 }
  0x62   : > { %851 = vmatpush1.bf16.msra.mxu1 %v3148_v22 }
  0x63   : > { %852 = vmatprep.subr.bf16.mxu1 %v3155_v23 }
  0x64   : > { %2806 = vmatpush3.bf16.msra.mxu0 %v3178_v44 }
  0x65   : > { %682 = vmatmul.mubr.bf16.gmra.mrb[4].mxu0 %v3151_v24  ;;  %722 = vmatmul.mubr.bf16.gmra.mrb[4].mxu1 %v3152_v25 }
  0x66   : > { %853 = vmatpush1.bf16.msra.mxu1 %v3153_v26  ;;  %691 = vmatprep.mubr.bf16.mxu0 %v3539_v2 }
  0x67   : > { %854 = vmatprep.subr.bf16.mxu1 %v3158_v27  ;;  %731 = vmatprep.mubr.bf16.mxu1 %v3539_v2 }
  0x68   : > { %2807 = vmatprep.subr.bf16.mxu0 %v3179_v45 }
  0x69   : > { %2808 = vmatpush3.bf16.msra.mxu0 %v3180_v46 }
  0x6a   : > { %855 = vmatpush1.bf16.msra.mxu1 %v3156_v28  ;;  %2809 = vmatprep.subr.bf16.mxu0 %v3181_v47 }
  0x6b   : > { %856 = vmatprep.subr.bf16.mxu1 %v3163_v29 }
  0x6d   : > { %692 = vmatmul.mubr.bf16.gmra.mrb[8].mxu0 %v3159_v30  ;;  %732 = vmatmul.mubr.bf16.gmra.mrb[8].mxu1 %v3160_v31 }
  0x6e   : > { %857 = vmatpush1.bf16.msra.mxu1 %v3161_v32  ;;  %701 = vmatprep.mubr.bf16.mxu0 %v3539_v2 }
  0x6f   : > { %858 = vmatprep.subr.bf16.mxu1 %v3166_v33  ;;  %741 = vmatprep.mubr.bf16.mxu1 %v3539_v2 }
  0x70   : > { %2810 = vmatpush3.bf16.msra.mxu0 %v3182_v48 }
  0x71   : > { %2811 = vmatprep.subr.bf16.mxu0 %v3183_v49 }
  0x72   : > { %859 = vmatpush1.bf16.msra.mxu1 %v3164_v34 }
  0x73   : > { %860 = vmatprep.subr.bf16.mxu1 %v3171_v35 }
  0x74   : > { %2812 = vmatpush3.bf16.msra.mxu0 %v3184_v50 }
  0x75   : > { %702 = vmatmul.mubr.bf16.gmra.mrb[12].mxu0 %v3167_v36  ;;  %742 = vmatmul.mubr.bf16.gmra.mrb[12].mxu1 %v3168_v37 }
  0x76   : > { %861 = vmatpush1.bf16.msra.mxu1 %v3169_v38  ;;  %880 = vmatprep.mubr.bf16.mxu1 %v3539_v2 }
  0x77   : > { %862 = vmatprep.subr.bf16.mxu1 %v3174_v39  ;;  %2813 = vmatprep.subr.bf16.mxu0 %v3185_v51 }
  0x78   : > { %2814 = vmatpush3.bf16.msra.mxu0 %v3186_v52 }
  0x79   : > { %2815 = vmatprep.subr.bf16.mxu0 %v3187_v53 }
  0x7a   : > { %863 = vmatpush1.bf16.msra.mxu1 %v3172_v40 }
  0x7c   : > { %2816 = vmatpush3.bf16.msra.mxu0 %v3188_v54 }
  0x7d   : > { %881 = vmatmul.mubr.bf16.vlgmr.msra.gmra.mrb[16].mxu1 %v3143_v17  ;;  %2817 = vmatprep.subr.bf16.mxu0 %v3189_v55 }
  0x7e   : > { %890 = vmatprep.mubr.bf16.mxu1 %v3539_v2 }
  0x80   : > { %2818 = vmatpush3.bf16.msra.mxu0 %v3190_v56 }
  0x85   : > { %891 = vmatmul.mubr.bf16.gmra.mrb[20].mxu1 %v3151_v24 }
  0x86   : > { %900 = vmatprep.mubr.bf16.mxu1 %v3539_v2 }
  0x8d   : > { %901 = vmatmul.mubr.bf16.gmra.mrb[24].mxu1 %v3159_v30 }
  0x8e   : > { %910 = vmatprep.mubr.bf16.mxu1 %v3539_v2 }
  0x95   : > { %911 = vmatmul.mubr.bf16.gmra.mrb[28].mxu1 %v3167_v36 }
  0x96   : > { %920 = vmatprep.mubr.bf16.mxu1 %v3539_v2 }
  0x9d   : > { %921 = vmatmul.mubr.bf16.gmra.mrb[32].mxu1 %v3766_v18 }
  0x9e   : > { %930 = vmatprep.mubr.bf16.mxu1 %v3539_v2 }
  0xa5   : > { %931 = vmatmul.mubr.bf16.gmra.mrb[36].mxu1 %v3152_v25 }
  0xa6   : > { %940 = vmatprep.mubr.bf16.mxu1 %v3539_v2 }
  0xad   : > { %941 = vmatmul.mubr.bf16.gmra.mrb[40].mxu1 %v3160_v31 }
  0xae   : > { %950 = vmatprep.mubr.bf16.mxu1 %v3539_v2 }
  0xb5   : > { %951 = vmatmul.mubr.bf16.gmra.mrb[44].mxu1 %v3168_v37 }
 0x130   : > { %v3886_v57 = vpop.f32.mrb[0].mxu0  ;;  %v3888_v58 = vpop.f32.mrb[0].mxu1 }
 0x131   : > { %v2615_v59 = vmul.f32 -1.442695, %v3886_v57  ;;  %v3891_v60 = vpop.f32.mrb[1].mxu0  ;;  %v3893_v61 = vpop.f32.mrb[1].mxu1  ;;  %v2631_v5 = vmul.f32 -1.442695, %v3888_v58 }
 0x132   : > { %v2616_v62 = vmul.f32 -1.442695, %v3891_v60  ;;  %v3896_v63 = vpop.f32.mrb[2].mxu0  ;;  %v3898_v0 = vpop.f32.mrb[2].mxu1  ;;  %v2632_v11 = vmul.f32 -1.442695, %v3893_v61 }
 0x133   : > { %3191 = vpow2.f32 %v2615_v59  ;;  %v2617_v1 = vmul.f32 -1.442695, %v3896_v63  ;;  %v3901_v2 = vpop.f32.mrb[3].mxu0  ;;  %v3903_v3 = vpop.f32.mrb[3].mxu1  ;;  %v2633_v18 = vmul.f32 -1.442695, %v3898_v0 }
 0x134   : > { %3193 = vpow2.f32 %v2616_v62  ;;  %v2618_v4 = vmul.f32 -1.442695, %v3901_v2  ;;  %v2634_v20 = vmul.f32 -1.442695, %v3903_v3 }
 0x135   : > { %3195 = vpow2.f32 %v2617_v1 }
 0x136   : > { %3197 = vpow2.f32 %v2618_v4 }
 0x138   : > { %v3907_v6 = vpop.f32.mrb[4].mxu0  ;;  %v3909_v7 = vpop.f32.mrb[4].mxu1 }
 0x139   : > { %v2619_v8 = vmul.f32 -1.442695, %v3907_v6  ;;  %v3912_v9 = vpop.f32.mrb[5].mxu0  ;;  %v3914_v10 = vpop.f32.mrb[5].mxu1  ;;  %v2635_v27 = vmul.f32 -1.442695, %v3909_v7 }
 0x13a   : > { %v2620_v12 = vmul.f32 -1.442695, %v3912_v9  ;;  %v3918_v13 = vpop.f32.mrb[6].mxu0  ;;  %v3920_v14 = vpop.f32.mrb[6].mxu1  ;;  %v2636_v35 = vmul.f32 -1.442695, %v3914_v10 }
 0x13b   : > { %3199 = vpow2.f32 %v2619_v8  ;;  %v2621_v15 = vmul.f32 -1.442695, %v3918_v13  ;;  %v3923_v16 = vpop.f32.mrb[7].mxu0  ;;  %v3925_v17 = vpop.f32.mrb[7].mxu1 }
 0x13c   : > { %3201 = vpow2.f32 %v2631_v5  ;;  %v2622_v51 = vmul.f32 -1.442695, %v3923_v16 }
 0x13d   : > { %v3192_v19 = vpop.eup %3191  ;;  %3203 = vpow2.f32 %v2620_v12 }
 0x13e   : > { %v1057_v21 = vadd.f32 1.0, %v3192_v19  ;;  %3205 = vpow2.f32 %v2632_v11  ;;  %v3194_v22 = vpop.eup %3193 }
 0x13f   : > { %3207 = vpow2.f32 %v2621_v15  ;;  %v1058_v23 = vadd.f32 1.0, %v3194_v22  ;;  %v3196_v26 = vpop.eup %3195 }
 0x140   : > { %3209 = vpow2.f32 %v2633_v18  ;;  %v3929_v24 = vpop.f32.mrb[8].mxu0  ;;  %v3931_v25 = vpop.f32.mrb[8].mxu1  ;;  %v1059_v29 = vadd.f32 1.0, %v3196_v26 }
 0x141   : > { %3211 = vpow2.f32 %v2634_v20  ;;  %v3934_v28 = vpop.f32.mrb[9].mxu0  ;;  %v3936_v30 = vpop.f32.mrb[9].mxu1  ;;  %v2623_v1 = vmul.f32 -1.442695, %v3929_v24 }
 0x142   : > { %3213 = vrcp.f32 %v1057_v21  ;;  %v3938_v31 = vpop.f32.mrb[10].mxu0  ;;  %v3198_v32 = vpop.eup %3197  ;;  %v2624_v12 = vmul.f32 -1.442695, %v3934_v28 }
 0x143   : > { %3215 = vrcp.f32 %v1058_v23  ;;  %v3940_v33 = vpop.f32.mrb[10].mxu1  ;;  %v1060_v34 = vadd.f32 1.0, %v3198_v32  ;;  %v3943_v36 = vpop.f32.mrb[11].mxu0  ;;  %v2625_v22 = vmul.f32 -1.442695, %v3938_v31 }
 0x144   : > { %3217 = vrcp.f32 %v1059_v29  ;;  %v3945_v37 = vpop.f32.mrb[11].mxu1 }
 0x145   : > { %v3200_v38 = vpop.eup %3199  ;;  %3219 = vpow2.f32 %v2635_v27  ;;  %v2637_v27 = vmul.f32 -1.442695, %v3920_v14 }
 0x146   : > { %v3202_v39 = vpop.eup %3201  ;;  %3221 = vrcp.f32 %v1060_v34  ;;  %v1061_v40 = vadd.f32 1.0, %v3200_v38 }
 0x147   : > { %v3204_v41 = vpop.eup %3203  ;;  %3223 = vpow2.f32 %v2636_v35  ;;  %v1073_v47 = vadd.f32 1.0, %v3202_v39 }
 0x148   : > { %v3206_v42 = vpop.eup %3205  ;;  %v1062_v43 = vadd.f32 1.0, %v3204_v41  ;;  %v3947_v44 = vpop.f32.mrb[12].mxu0  ;;  %3225 = vrcp.f32 %v1061_v40 }
 0x149   : > { %v3949_v45 = vpop.f32.mrb[12].mxu1  ;;  %v3208_v46 = vpop.eup %3207  ;;  %v1074_v55 = vadd.f32 1.0, %v3206_v42 }
 0x14a   : > { %v3951_v48 = vpop.f32.mrb[13].mxu0  ;;  %v3210_v49 = vpop.eup %3209  ;;  %v1063_v50 = vadd.f32 1.0, %v3208_v46  ;;  %3227 = vrcp.f32 %v1062_v43 }
 0x14b   : > { %v3954_v52 = vpop.f32.mrb[13].mxu1  ;;  %v3956_v53 = vpop.f32.mrb[14].mxu0  ;;  %v1075_v8 = vadd.f32 1.0, %v3210_v49 }
 0x14c   : > { %v3212_v54 = vpop.eup %3211  ;;  %v3958_v56 = vpop.f32.mrb[14].mxu1  ;;  %3229 = vrcp.f32 %v1063_v50 }
 0x14d   : > { %v3960_v59 = vpop.f32.mrb[15].mxu0  ;;  %v3214_v62 = vpop.eup %3213  ;;  %3231 = vrcp.f32 %v1073_v47  ;;  %v1076_v19 = vadd.f32 1.0, %v3212_v54 }
 0x14e   : > { %v3963_v4 = vpop.f32.mrb[15].mxu1  ;;  %v3216_v5 = vpop.eup %3215  ;;  %3233 = vpow2.f32 %v2622_v51  ;;  %v1153_v18 = vmul.f32 %v3214_v62, %v3886_v57  ;;  %v2626_v57 = vmul.f32 -1.442695, %v3943_v36 }
 0x14f   : > { %v3218_v11 = vpop.eup %3217  ;;  %3235 = vrcp.f32 %v1074_v55  ;;  %v1154_v21 = vmul.f32 %v3216_v5, %v3891_v60  ;;  %v2639_v5 = vmul.f32 -1.442695, %v3931_v25 }
 0x150   : > { %v3220_v15 = vpop.eup %3219  ;;  %3237 = vpow2.f32 %v2623_v1  ;;  %v882_v23 = vpop.f32.mrb[16].mxu1  ;;  %v1155_v26 = vmul.f32 %v3218_v11, %v3896_v63  ;;  %v2627_v63 = vmul.f32 -1.442695, %v3947_v44 }
 0x151   : > { %v3222_v20 = vpop.eup %3221  ;;  %3239 = vrcp.f32 %v1075_v8  ;;  %v1185_v29 = vmul.f32 %v1153_v18, %v882_v23  ;;  %v884_v32 = vpop.f32.mrb[17].mxu1  ;;  %v1077_v60 = vadd.f32 1.0, %v3220_v15 }
 0x152   : > { %v3224_v34 = vpop.eup %3223  ;;  %v1156_v35 = vmul.f32 %v3222_v20, %v3901_v2  ;;  %3241 = vpow2.f32 %v2624_v12  ;;  %v1186_v38 = vmul.f32 %v1154_v21, %v884_v32  ;;  %v886_v39 = vpop.f32.mrb[18].mxu1  ;;  %v2638_v2 = vmul.f32 -1.442695, %v3925_v17 }
 0x153   : > { %3243 = vrcp.f32 %v1076_v19  ;;  %v1187_v40 = vmul.f32 %v1155_v26, %v886_v39  ;;  %v888_v41 = vpop.f32.mrb[19].mxu1  ;;  %v3226_v42 = vpop.eup %3225  ;;  %v1078_v47 = vadd.f32 1.0, %v3224_v34  ;;  %v2640_v20 = vmul.f32 -1.442695, %v3936_v30 }
 0x154   : > { %3245 = vpow2.f32 %v2625_v22  ;;  %v1188_v43 = vmul.f32 %v1156_v35, %v888_v41  ;;  %v3228_v46 = vpop.eup %3227  ;;  %v1157_v55 = vmul.f32 %v3226_v42, %v3907_v6  ;;  %v2643_v41 = vmul.f32 -1.442695, %v3949_v45 }
 0x155   : > { %3247 = vpow2.f32 %v2637_v27  ;;  %v1217_v49 = vpack.c.bf16 %v1187_v40, %v1185_v29  ;;  %v1158_v1 = vmul.f32 %v3228_v46, %v3912_v9  ;;  %v2641_v29 = vmul.f32 -1.442695, %v3940_v33 }
 0x156   : > { %v3230_v50 = vpop.eup %3229  ;;  %3249 = vpow2.f32 %v2626_v57  ;;  %v1218_v51 = vpack.c.bf16 %v1188_v43, %v1186_v38  ;;  %v2642_v38 = vmul.f32 -1.442695, %v3945_v37 }
 0x157   : > { %v3975_v54 = vpop.eup %3231  ;;  %3251 = vrcp.f32 %v1077_v60  ;;  %v1159_v12 = vmul.f32 %v3230_v50, %v3918_v13 }
 0x158   : > { %v3234_v62 = vpop.eup %3233  ;;  %3253 = vpow2.f32 %v2627_v63  ;;  %v892_v8 = vpop.f32.mrb[20].mxu1  ;;  %1393 = vmatprep.mubr.bf16.mxu0 %v1218_v51 }
 0x159   : > { %v3980_v11 = vpop.eup %3235  ;;  %3255 = vrcp.f32 %v1078_v47  ;;  %v1064_v15 = vadd.f32 1.0, %v3234_v62  ;;  %v3983_v18 = vmul.f32 %v1157_v55, %v892_v8  ;;  %v894_v19 = vpop.f32.mrb[21].mxu1  ;;  %1394 = vmatmul.mubr.bf16.vlgmr.msra.gmra.mrb[16].mxu0 %v1217_v49  ;;  %v2628_v55 = vmul.f32 -1.442695, %v3951_v48 }
 0x15a   : > { %v3238_v6 = vpop.eup %3237  ;;  %3257 = vpow2.f32 %v2638_v2  ;;  %v3986_v9 = vmul.f32 %v1158_v1, %v894_v19  ;;  %v896_v21 = vpop.f32.mrb[22].mxu1 }
 0x15b   : > { %v3988_v22 = vpop.eup %3239  ;;  %3259 = vrcp.f32 %v1064_v15  ;;  %v1065_v23 = vadd.f32 1.0, %v3238_v6  ;;  %v3990_v26 = vmul.f32 %v1159_v12, %v896_v21  ;;  %v898_v27 = vpop.f32.mrb[23].mxu1  ;;  %v2629_v12 = vmul.f32 -1.442695, %v3956_v53 }
 0x15c   : > { %v3242_v13 = vpop.eup %3241  ;;  %3261 = vpow2.f32 %v2639_v5  ;;  %v2644_v5 = vmul.f32 -1.442695, %v3954_v52  ;;  %v2645_v6 = vmul.f32 -1.442695, %v3958_v56  ;;  %v2630_v21 = vmul.f32 -1.442695, %v3960_v59 }
 0x15d   : > { %v3993_v32 = vpop.eup %3243  ;;  %3263 = vrcp.f32 %v1065_v23  ;;  %v1066_v34 = vadd.f32 1.0, %v3242_v13  ;;  %v1219_v35 = vpack.c.bf16 %v3990_v26, %v3983_v18 }
 0x15e   : > { %v3246_v57 = vpop.eup %3245  ;;  %3265 = vpow2.f32 %v2640_v20 }
 0x15f   : > { %v3248_v39 = vpop.eup %3247  ;;  %3267 = vrcp.f32 %v1066_v34  ;;  %v1067_v60 = vadd.f32 1.0, %v3246_v57 }
 0x160   : > { %v3250_v40 = vpop.eup %3249  ;;  %3269 = vpow2.f32 %v2641_v29  ;;  %v902_v42 = vpop.f32.mrb[24].mxu1  ;;  %v1079_v49 = vadd.f32 1.0, %v3248_v39  ;;  %v2646_v29 = vmul.f32 -1.442695, %v3963_v4 }
 0x161   : > { %v3999_v63 = vpop.eup %3251  ;;  %3271 = vrcp.f32 %v1067_v60  ;;  %v1068_v43 = vadd.f32 1.0, %v3250_v40  ;;  %v904_v46 = vpop.f32.mrb[25].mxu1 }
 0x162   : > { %v3254_v47 = vpop.eup %3253  ;;  %3273 = vpow2.f32 %v2642_v38  ;;  %v906_v50 = vpop.f32.mrb[26].mxu1 }
 0x163   : > { %v4001_v2 = vpop.eup %3255  ;;  %3275 = vrcp.f32 %v1068_v43  ;;  %v1069_v51 = vadd.f32 1.0, %v3254_v47  ;;  %v908_v62 = vpop.f32.mrb[27].mxu1 }
 0x164   : > { %v3258_v1 = vpop.eup %3257  ;;  %3277 = vpow2.f32 %v2643_v41 }
 0x165   : > { %v3260_v8 = vpop.eup %3259  ;;  %3279 = vrcp.f32 %v1069_v51  ;;  %v1080_v39 = vadd.f32 1.0, %v3258_v1 }
 0x166   : > { %v3262_v15 = vpop.eup %3261  ;;  %3281 = vrcp.f32 %v1079_v49  ;;  %v1160_v19 = vmul.f32 %v3260_v8, %v3923_v16 }
 0x167   : > { %v3264_v20 = vpop.eup %3263  ;;  %3283 = vpow2.f32 %v2628_v55  ;;  %v1081_v51 = vadd.f32 1.0, %v3262_v15  ;;  %v1169_v15 = vmul.f32 %v3975_v54, %v3888_v58 }
 0x168   : > { %v3266_v23 = vpop.eup %3265  ;;  %v1161_v13 = vmul.f32 %v3264_v20, %v3929_v24  ;;  %3285 = vpow2.f32 %v2644_v5  ;;  %v1192_v34 = vmul.f32 %v1160_v19, %v898_v27  ;;  %v912_v57 = vpop.f32.mrb[28].mxu1 }
 0x169   : > { %v3268_v38 = vpop.eup %3267  ;;  %3287 = vpow2.f32 %v2629_v12  ;;  %v4011_v60 = vpop.f32.mrb[29].mxu1 }
 0x16a   : > { %v3270_v16 = vpop.eup %3269  ;;  %v1162_v40 = vmul.f32 %v3268_v38, %v3934_v28  ;;  %3289 = vpow2.f32 %v2645_v6  ;;  %v1220_v41 = vpack.c.bf16 %v1192_v34, %v3986_v9  ;;  %v1193_v43 = vmul.f32 %v1161_v13, %v902_v42  ;;  %v4015_v47 = vpop.f32.mrb[30].mxu1 }
 0x16b   : > { %v3272_v24 = vpop.eup %3271  ;;  %3291 = vpow2.f32 %v2630_v21  ;;  %v4017_v49 = vpop.f32.mrb[31].mxu1  ;;  %v1082_v28 = vadd.f32 1.0, %v3266_v23  ;;  %v1083_v19 = vadd.f32 1.0, %v3270_v16 }
 0x16c   : > { %v3274_v27 = vpop.eup %3273  ;;  %v1163_v55 = vmul.f32 %v3272_v24, %v3938_v31  ;;  %3293 = vpow2.f32 %v2646_v29  ;;  %1401 = vmatprep.mubr.bf16.mxu0 %v1220_v41  ;;  %v1194_v1 = vmul.f32 %v1162_v40, %v904_v46  ;;  %v1170_v31 = vmul.f32 %v3980_v11, %v3893_v61 }
 0x16d   : > { %v3276_v5 = vpop.eup %3275  ;;  %3295 = vrcp.f32 %v1080_v39  ;;  %1402 = vmatmul.mubr.bf16.gmra.mrb[20].mxu0 %v1219_v35  ;;  %v1171_v46 = vmul.f32 %v3988_v22, %v3898_v0  ;;  %v1084_v58 = vadd.f32 1.0, %v3274_v27  ;;  %v1173_v24 = vmul.f32 %v3999_v63, %v3909_v7 }
 0x16e   : > { %v3278_v9 = vpop.eup %3277  ;;  %v1164_v42 = vmul.f32 %v3276_v5, %v3943_v36  ;;  %v1195_v8 = vmul.f32 %v1163_v55, %v906_v50  ;;  %3297 = vrcp.f32 %v1081_v51  ;;  %v1172_v50 = vmul.f32 %v3993_v32, %v3903_v3 }
 0x16f   : > { %v3280_v12 = vpop.eup %3279  ;;  %3299 = vrcp.f32 %v1082_v28  ;;  %v1085_v16 = vadd.f32 1.0, %v3278_v9  ;;  %v1174_v51 = vmul.f32 %v4001_v2, %v3914_v10 }
 0x170   : > { %v3282_v6 = vpop.eup %3281  ;;  %v1165_v18 = vmul.f32 %v3280_v12, %v3947_v44  ;;  %v1221_v26 = vpack.c.bf16 %v1195_v8, %v1193_v43  ;;  %v1196_v35 = vmul.f32 %v1164_v42, %v908_v62  ;;  %v922_v20 = vpop.f32.mrb[32].mxu1  ;;  %3301 = vrcp.f32 %v1083_v19 }
 0x171   : > { %v3284_v36 = vpop.eup %3283  ;;  %v4033_v54 = vmul.f32 %v1169_v15, %v922_v20  ;;  %v924_v61 = vpop.f32.mrb[33].mxu1  ;;  %v1175_v5 = vmul.f32 %v3282_v6, %v3920_v14 }
 0x172   : > { %v3286_v11 = vpop.eup %3285  ;;  %v1070_v21 = vadd.f32 1.0, %v3284_v36  ;;  %v1222_v0 = vpack.c.bf16 %v1196_v35, %v1194_v1  ;;  %v4035_v22 = vmul.f32 %v1165_v18, %v912_v57  ;;  %v4037_v23 = vmul.f32 %v1170_v31, %v924_v61  ;;  %v926_v44 = vpop.f32.mrb[34].mxu1 }
 0x173   : > { %v3288_v13 = vpop.eup %3287  ;;  %v4039_v62 = vmul.f32 %v1171_v46, %v926_v44  ;;  %v928_v29 = vpop.f32.mrb[35].mxu1  ;;  %v1086_v27 = vadd.f32 1.0, %v3286_v11 }
 0x174   : > { %v3290_v34 = vpop.eup %3289  ;;  %3303 = vrcp.f32 %v1070_v21  ;;  %v1071_v3 = vadd.f32 1.0, %v3288_v13  ;;  %1409 = vmatprep.mubr.bf16.mxu0 %v1222_v0  ;;  %v4041_v32 = vmul.f32 %v1172_v50, %v928_v29 }
 0x175   : > { %v3292_v38 = vpop.eup %3291  ;;  %3305 = vrcp.f32 %v1084_v58  ;;  %1410 = vmatmul.mubr.bf16.gmra.mrb[24].mxu0 %v1221_v26  ;;  %v1225_v57 = vpack.c.bf16 %v4039_v62, %v4033_v54  ;;  %v1087_v55 = vadd.f32 1.0, %v3290_v34 }
 0x176   : > { %v3294_v39 = vpop.eup %3293  ;;  %3307 = vrcp.f32 %v1071_v3  ;;  %v1072_v40 = vadd.f32 1.0, %v3292_v38  ;;  %v1226_v41 = vpack.c.bf16 %v4041_v32, %v4037_v23 }
 0x177   : > { %v3296_v43 = vpop.eup %3295  ;;  %v1088_v28 = vadd.f32 1.0, %v3294_v39 }
 0x178   : > { %3309 = vrcp.f32 %v1072_v40  ;;  %v932_v1 = vpop.f32.mrb[36].mxu1  ;;  %v3298_v8 = vpop.eup %3297  ;;  %v1176_v12 = vmul.f32 %v3296_v43, %v3925_v17 }
 0x179   : > { %v4052_v9 = vmul.f32 %v1173_v24, %v932_v1  ;;  %v934_v42 = vpop.f32.mrb[37].mxu1  ;;  %3311 = vrcp.f32 %v1085_v16  ;;  %v3300_v7 = vpop.eup %3299  ;;  %v1177_v26 = vmul.f32 %v3298_v8, %v3931_v25 }
 0x17a   : > { %v1206_v15 = vmul.f32 %v1174_v51, %v934_v42  ;;  %v936_v31 = vpop.f32.mrb[38].mxu1  ;;  %3313 = vrcp.f32 %v1086_v27  ;;  %v3302_v2 = vpop.eup %3301  ;;  %v1178_v20 = vmul.f32 %v3300_v7, %v3936_v30 }
 0x17b   : > { %v1207_v63 = vmul.f32 %v1175_v5, %v936_v31  ;;  %v938_v46 = vpop.f32.mrb[39].mxu1  ;;  %3315 = vrcp.f32 %v1087_v55  ;;  %v1179_v50 = vmul.f32 %v3302_v2, %v3940_v33 }
 0x17c   : > { %v1208_v10 = vmul.f32 %v1176_v12, %v938_v46  ;;  %3317 = vrcp.f32 %v1088_v28 }
 0x17d   : > { %v1227_v14 = vpack.c.bf16 %v1207_v63, %v4052_v9 }
 0x17e   : > { %v3304_v19 = vpop.eup %3303  ;;  %v1228_v6 = vpack.c.bf16 %v1208_v10, %v1206_v15 }
 0x17f   : > { %v3306_v18 = vpop.eup %3305  ;;  %v1166_v17 = vmul.f32 %v3304_v19, %v3951_v48 }
 0x180   : > { %v3308_v35 = vpop.eup %3307  ;;  %v942_v36 = vpop.f32.mrb[40].mxu1  ;;  %v1180_v44 = vmul.f32 %v3306_v18, %v3945_v37 }
 0x181   : > { %v1167_v58 = vmul.f32 %v3308_v35, %v3956_v53  ;;  %v1198_v61 = vmul.f32 %v1166_v17, %v4011_v60  ;;  %v1209_v11 = vmul.f32 %v1177_v26, %v942_v36  ;;  %v944_v21 = vpop.f32.mrb[41].mxu1 }
 0x182   : > { %v3310_v0 = vpop.eup %3309  ;;  %v1210_v13 = vmul.f32 %v1178_v20, %v944_v21  ;;  %v946_v29 = vpop.f32.mrb[42].mxu1 }
 0x183   : > { %v1168_v25 = vmul.f32 %v3310_v0, %v3960_v59  ;;  %v1199_v48 = vmul.f32 %v1167_v58, %v4015_v47  ;;  %v1211_v34 = vmul.f32 %v1179_v50, %v946_v29  ;;  %v948_v30 = vpop.f32.mrb[43].mxu1  ;;  %v3312_v3 = vpop.eup %3311 }
 0x184   : > { %v1212_v38 = vmul.f32 %v1180_v44, %v948_v30  ;;  %v3314_v33 = vpop.eup %3313  ;;  %v1181_v37 = vmul.f32 %v3312_v3, %v3949_v45 }
 0x185   : > { %v1223_v53 = vpack.c.bf16 %v1199_v48, %v4035_v22  ;;  %v1200_v60 = vmul.f32 %v1168_v25, %v4017_v49  ;;  %v1229_v39 = vpack.c.bf16 %v1211_v34, %v1209_v11  ;;  %v3316_v16 = vpop.eup %3315  ;;  %v1182_v59 = vmul.f32 %v3314_v33, %v3954_v52 }
 0x186   : > { %v1230_v40 = vpack.c.bf16 %v1212_v38, %v1210_v13  ;;  %v3318_v43 = vpop.eup %3317  ;;  %v1183_v47 = vmul.f32 %v3316_v16, %v3958_v56 }
 0x187   : > { %v1224_v24 = vpack.c.bf16 %v1200_v60, %v1198_v61  ;;  %v1184_v1 = vmul.f32 %v3318_v43, %v3963_v4 }
 0x188   : > { %v952_v27 = vpop.f32.mrb[44].mxu1 }
 0x189   : > { %1417 = vmatprep.mubr.bf16.mxu0 %v1224_v24  ;;  %v1213_v51 = vmul.f32 %v1181_v37, %v952_v27  ;;  %v954_v55 = vpop.f32.mrb[45].mxu1 }
 0x18a   : > { %1418 = vmatmul.mubr.bf16.gmra.mrb[28].mxu0 %v1223_v53  ;;  %v1214_v22 = vmul.f32 %v1182_v59, %v954_v55  ;;  %v956_v49 = vpop.f32.mrb[46].mxu1 }
 0x18b   : > { %1425 = vmatprep.mubr.bf16.mxu0 %v1226_v41  ;;  %v1215_v5 = vmul.f32 %v1183_v47, %v956_v49  ;;  %v958_v45 = vpop.f32.mrb[47].mxu1 }
 0x18c   : > { %v1216_v28 = vmul.f32 %v1184_v1, %v958_v45 }
 0x18d   : > { %v1231_v9 = vpack.c.bf16 %v1215_v5, %v1213_v51 }
 0x18e   : > { %v1232_v52 = vpack.c.bf16 %v1216_v28, %v1214_v22 }
 0x192   : > { %1426 = vmatmul.mubr.bf16.gmra.mrb[32].mxu0 %v1225_v57 }
 0x193   : > { %1433 = vmatprep.mubr.bf16.mxu0 %v1228_v6 }
 0x19a   : > { %1434 = vmatmul.mubr.bf16.gmra.mrb[36].mxu0 %v1227_v14 }
 0x19b   : > { %1441 = vmatprep.mubr.bf16.mxu0 %v1230_v40 }
 0x1a2   : > { %1442 = vmatmul.mubr.bf16.gmra.mrb[40].mxu0 %v1229_v39 }
 0x1a3   : > { %1449 = vmatprep.mubr.bf16.mxu0 %v1232_v52 }
 0x1aa   : > { %1450 = vmatmul.mubr.bf16.gmra.mrb[44].mxu0 %v1231_v9 }
 0x22c   : > { %v2819_v56 = vpop.f32.mrb[16].mxu0 }
 0x22d   : > { %v2820_v4 = vpop.f32.mrb[17].mxu0 }
 0x22e   : > { %v2821_v42 = vadd.f32 %v2820_v4, %v2819_v56  ;;  %v2822_v23 = vpop.f32.mrb[18].mxu0 }
 0x22f   : > { %v2823_v32 = vpop.f32.mrb[19].mxu0 }
 0x230   : > { %1458 = vst [vmem:[#allocation2] sm:$0xff] %v2821_v42  ;;  %v2824_v41 = vadd.f32 %v2823_v32, %v2822_v23 }
 0x232   : > { %1459 = vst [vmem:[#allocation2 + $0x8] sm:$0xff] %v2824_v41 }
 0x240   : > { %v2825_v8 = vpop.f32.mrb[20].mxu0 }
 0x241   : > { %v2826_v12 = vpop.f32.mrb[21].mxu0 }
 0x242   : > { %v2827_v15 = vadd.f32 %v2826_v12, %v2825_v8  ;;  %v2828_v31 = vpop.f32.mrb[22].mxu0 }
 0x243   : > { %v2829_v54 = vpop.f32.mrb[23].mxu0 }
 0x244   : > { %1460 = vst [vmem:[#allocation2 + $0x10] sm:$0xff] %v2827_v15  ;;  %v2830_v62 = vadd.f32 %v2829_v54, %v2828_v31 }
 0x246   : > { %1461 = vst [vmem:[#allocation2 + $0x18] sm:$0xff] %v2830_v62 }
 0x248   : > { %v2831_v57 = vpop.f32.mrb[24].mxu0 }
 0x249   : > { %v2832_v7 = vpop.f32.mrb[25].mxu0 }
 0x24a   : > { %v2833_v63 = vadd.f32 %v2832_v7, %v2831_v57  ;;  %v2834_v46 = vpop.f32.mrb[26].mxu0 }
 0x24b   : > { %v2835_v10 = vpop.f32.mrb[27].mxu0 }
 0x24c   : > { %1462 = vst [vmem:[#allocation2 + $0x20] sm:$0xff] %v2833_v63  ;;  %v2836_v2 = vadd.f32 %v2835_v10, %v2834_v46 }
 0x24e   : > { %1463 = vst [vmem:[#allocation2 + $0x28] sm:$0xff] %v2836_v2 }
 0x25d   : > { %v2837_v14 = vpop.f32.mrb[28].mxu0 }
 0x25e   : > { %v2838_v19 = vpop.f32.mrb[29].mxu0 }
 0x25f   : > { %v2839_v6 = vadd.f32 %v2838_v19, %v2837_v14  ;;  %v2840_v18 = vpop.f32.mrb[30].mxu0 }
 0x260   : > { %v2841_v26 = vpop.f32.mrb[31].mxu0 }
 0x261   : > { %1464 = vst [vmem:[#allocation2 + $0x30] sm:$0xff] %v2839_v6  ;;  %v2842_v17 = vadd.f32 %v2841_v26, %v2840_v18 }
 0x263   : > { %1465 = vst [vmem:[#allocation2 + $0x38] sm:$0xff] %v2842_v17 }
 0x265   : > { %v2843_v35 = vpop.f32.mrb[32].mxu0 }
 0x266   : > { %v2844_v20 = vpop.f32.mrb[33].mxu0 }
 0x267   : > { %v2845_v36 = vadd.f32 %v2844_v20, %v2843_v35  ;;  %v2846_v50 = vpop.f32.mrb[34].mxu0 }
 0x268   : > { %v2847_v58 = vpop.f32.mrb[35].mxu0 }
 0x269   : > { %1466 = vst [vmem:[#allocation2 + $0x40] sm:$0xff] %v2845_v36  ;;  %v2848_v61 = vadd.f32 %v2847_v58, %v2846_v50 }
 0x26b   : > { %1467 = vst [vmem:[#allocation2 + $0x48] sm:$0xff] %v2848_v61 }
 0x26d   : > { %v2849_v11 = vpop.f32.mrb[36].mxu0 }
 0x26e   : > { %v2850_v21 = vpop.f32.mrb[37].mxu0 }
 0x26f   : > { %v2851_v0 = vadd.f32 %v2850_v21, %v2849_v11  ;;  %v2852_v44 = vpop.f32.mrb[38].mxu0 }
 0x270   : > { %v2853_v13 = vpop.f32.mrb[39].mxu0 }
 0x271   : > { %1468 = vst [vmem:[#allocation2 + $0x50] sm:$0xff] %v2851_v0  ;;  %v2854_v29 = vadd.f32 %v2853_v13, %v2852_v44 }
 0x273   : > { %1469 = vst [vmem:[#allocation2 + $0x58] sm:$0xff] %v2854_v29 }
 0x275   : > { %v2855_v25 = vpop.f32.mrb[40].mxu0 }
 0x276   : > { %v2856_v48 = vpop.f32.mrb[41].mxu0 }
 0x277   : > { %v2857_v34 = vadd.f32 %v2856_v48, %v2855_v25  ;;  %v2858_v30 = vpop.f32.mrb[42].mxu0 }
 0x278   : > { %v2859_v3 = vpop.f32.mrb[43].mxu0 }
 0x279   : > { %1470 = vst [vmem:[#allocation2 + $0x60] sm:$0xff] %v2857_v34  ;;  %v2860_v38 = vadd.f32 %v2859_v3, %v2858_v30 }
 0x27b   : > { %1471 = vst [vmem:[#allocation2 + $0x68] sm:$0xff] %v2860_v38 }
 0x27d   : > { %v2861_v33 = vpop.f32.mrb[44].mxu0 }
 0x27e   : > { %v2862_v53 = vpop.f32.mrb[45].mxu0 }
 0x27f   : > { %v2863_v60 = vadd.f32 %v2862_v53, %v2861_v33  ;;  %v2864_v39 = vpop.f32.mrb[46].mxu0 }
 0x280   : > { %v2865_v16 = vpop.f32.mrb[47].mxu0 }
 0x281   : > { %1472 = vst [vmem:[#allocation2 + $0x70] sm:$0xff] %v2863_v60  ;;  %v2866_v40 = vadd.f32 %v2865_v16, %v2864_v39 }
 0x283   : > { %1473 = vst [vmem:[#allocation2 + $0x78] sm:$0xff] %v2866_v40 }
 0x284 PF: > { %s1474_s3 = sld [smem:[#allocation4 + %s3523_s25]] }
 0x28a   : > { %p2663_p1 = scmp.ge.s32.totalorder %s3519_s24, %s1474_s3 }
 0x28b   : > { %v3319_v43 = vld [vmem:[%s3699_s27] sm:$0xff] (!%p2663_p1)   ;;  %v3320_v37 = vld [vmem:[%s3699_s27 + $0x8] sm:$0xff] (!%p2663_p1)   ;;  %v3321_v24 = vld [vmem:[%s3699_s27 + $0x10] sm:$0xff] (!%p2663_p1)   ;;  %v2165_v10 = vlaneseq (!%p2663_p1)  ;;  %vm2201_vm0 = vcmask (!%p2663_p1), 64512  }
 0x28c   : > { %1478 = sbr.rel (%p2663_p1) target bundleno = 1177 (0x499), region = 60  ;;  %2915 = vmatprep.subr.bf16.mxu0 (!%p2663_p1), %v3319_v43  ;;  %v3326_v59 = vld [vmem:[%s3704_s15] sm:$0xff] (!%p2663_p1)   ;;  %v3322_v27 = vld [vmem:[%s3699_s27 + $0x18] sm:$0xff] (!%p2663_p1)   ;;  %v3328_v47 = vld [vmem:[%s3704_s15 + $0x8] sm:$0xff] (!%p2663_p1)  }
 0x28d   : > { %2916 = vmatpush3.bf16.msra.mxu0 (!%p2663_p1), %v3319_v43  ;;  %2947 = vmatprep.subr.bf16.mxu1 (!%p2663_p1), %v3326_v59  ;;  %v3329_v51 = vld [vmem:[%s3683_s16] sm:$0xff] (!%p2663_p1)   ;;  %v3331_v1 = vld [vmem:[%s3704_s15 + $0x10] sm:$0xff] (!%p2663_p1)   ;;  %v3332_v22 = vld [vmem:[%s3704_s15 + $0x18] sm:$0xff] (!%p2663_p1)   ;;  %v2166_v2 = vand.u32 (!%p2663_p1), 127, %v2165_v10 }
 0x28e   : > { %2917 = vmatprep.subr.bf16.mxu0 (!%p2663_p1), %v3320_v37  ;;  %2948 = vmatpush3.bf16.msra.mxu1 (!%p2663_p1), %v3326_v59  ;;  %v3323_v55 = vld [vmem:[%s3699_s27 + $0x20] sm:$0xff] (!%p2663_p1)   ;;  %v3324_v49 = vld [vmem:[%s3699_s27 + $0x28] sm:$0xff] (!%p2663_p1)   ;;  %v3325_v45 = vld [vmem:[%s3699_s27 + $0x30] sm:$0xff] (!%p2663_p1)  }
 0x28f   : > { %2949 = vmatprep.subr.bf16.mxu1 (!%p2663_p1), %v3328_v47  ;;  %2931 = vmatprep.mubr.bf16.mxu0 (!%p2663_p1), %v3329_v51  ;;  %v3335_v5 = vld [vmem:[%s3704_s15 + $0x20] sm:$0xff] (!%p2663_p1)   ;;  %v3327_v28 = vld [vmem:[%s3699_s27 + $0x38] sm:$0xff] (!%p2663_p1)   ;;  %v3336_v9 = vld [vmem:[%s3704_s15 + $0x28] sm:$0xff] (!%p2663_p1)  }
 0x290   : > { %2963 = vmatprep.mubr.bf16.mxu1 (!%p2663_p1), %v3329_v51  ;;  %v3339_v52 = vld [vmem:[%s3704_s15 + $0x30] sm:$0xff] (!%p2663_p1)   ;;  %v3330_v56 = vld [vmem:[%s3683_s16 + $0x8] sm:$0xff] (!%p2663_p1)   ;;  %v3340_v42 = vld [vmem:[%s3704_s15 + $0x38] sm:$0xff] (!%p2663_p1)  }
 0x291   : > { %2918 = vmatpush3.bf16.msra.mxu0 (!%p2663_p1), %v3320_v37  ;;  %v3333_v4 = vld [vmem:[%s3683_s16 + $0x10] sm:$0xff] (!%p2663_p1)   ;;  %v3334_v23 = vld [vmem:[%s3683_s16 + $0x18] sm:$0xff] (!%p2663_p1)   ;;  %v3337_v32 = vld [vmem:[%s3683_s16 + $0x20] sm:$0xff] (!%p2663_p1)  }
 0x292   : > { %2919 = vmatprep.subr.bf16.mxu0 (!%p2663_p1), %v3321_v24  ;;  %2950 = vmatpush3.bf16.msra.mxu1 (!%p2663_p1), %v3328_v47  ;;  %v3338_v41 = vld [vmem:[%s3683_s16 + $0x28] sm:$0xff] (!%p2663_p1)   ;;  %v3341_v8 = vld [vmem:[%s3683_s16 + $0x30] sm:$0xff] (!%p2663_p1)   ;;  %v3342_v12 = vld [vmem:[%s3683_s16 + $0x38] sm:$0xff] (!%p2663_p1)   ;;  %s1497_s16 = sld [smem:[#allocation5 + %s3691_s17]] (!%p2663_p1) }
 0x293   : > { %2951 = vmatprep.subr.bf16.mxu1 %v3331_v1  ;;  %v3343_v15 = vld [vmem:[%s3709_s1] sm:$0xff]   ;;  %v3344_v31 = vld [vmem:[%s3709_s1 + $0x8] sm:$0xff]   ;;  %v3345_v54 = vld [vmem:[%s3709_s1 + $0x10] sm:$0xff]  }
 0x294   : > { %v3346_v62 = vld [vmem:[%s3709_s1 + $0x18] sm:$0xff]   ;;  %v3347_v57 = vld [vmem:[%s3709_s1 + $0x20] sm:$0xff]   ;;  %v3348_v7 = vld [vmem:[%s3709_s1 + $0x28] sm:$0xff]  }
 0x295   : > { %2920 = vmatpush3.bf16.msra.mxu0 %v3321_v24  ;;  %v3349_v63 = vld [vmem:[%s3709_s1 + $0x30] sm:$0xff]   ;;  %v3350_v46 = vld [vmem:[%s3709_s1 + $0x38] sm:$0xff]   ;;  %v2169_v14 = vld [vmem:[%s3688_s26] sm:$0xff] }
 0x296   : > { %2921 = vmatprep.subr.bf16.mxu0 %v3322_v27  ;;  %2952 = vmatpush3.bf16.msra.mxu1 %v3331_v1  ;;  %v2171_v19 = vld [vmem:[%s3688_s26 + $0x10] sm:$0xff]  ;;  %v2170_v6 = vld [vmem:[%s3688_s26 + $0x8] sm:$0xff]  ;;  %v2172_v18 = vld [vmem:[%s3688_s26 + $0x18] sm:$0xff] }
 0x297   : > { %2953 = vmatprep.subr.bf16.mxu1 %v3332_v22  ;;  %v2173_v11 = vld [vmem:[%s3688_s26 + $0x20] sm:$0xff]  ;;  %v2174_v21 = vld [vmem:[%s3688_s26 + $0x28] sm:$0xff]  ;;  %v2175_v25 = vld [vmem:[%s3688_s26 + $0x30] sm:$0xff] }
 0x298   : > { %v2167_v26 = vstv %s1497_s16  ;;  %v2176_v48 = vld [vmem:[%s3688_s26 + $0x38] sm:$0xff]  ;;  %v2177_v33 = vld [vmem:[%s3688_s26 + $0x40] sm:$0xff]  ;;  %v2178_v53 = vld [vmem:[%s3688_s26 + $0x48] sm:$0xff] }
 0x299   : > { %2922 = vmatpush3.bf16.msra.mxu0 %v3322_v27  ;;  %vm4116_vm1 = vcmp.eq.s32.totalorder %v2166_v2, %v2167_v26  ;;  %v2179_v43 = vld [vmem:[%s3688_s26 + $0x50] sm:$0xff]  ;;  %v2180_v37 = vld [vmem:[%s3688_s26 + $0x58] sm:$0xff]  ;;  %v2181_v51 = vld [vmem:[%s3688_s26 + $0x60] sm:$0xff] }
 0x29a   : > { %2923 = vmatprep.subr.bf16.mxu0 %v3323_v55  ;;  %2954 = vmatpush3.bf16.msra.mxu1 %v3332_v22  ;;  %v2185_v35 = vsel %vm4116_vm1, %v2169_v14, 0.0  ;;  %v2187_v20 = vsel %vm4116_vm1, %v2171_v19, 0.0  ;;  %v2186_v36 = vsel %vm4116_vm1, %v2170_v6, 0.0  ;;  %v2188_v50 = vsel %vm4116_vm1, %v2172_v18, 0.0 }
 0x29b   : > { %2955 = vmatprep.subr.bf16.mxu1 %v3335_v5  ;;  %v2202_v58 = vsel %vm2201_vm0, %v2185_v35, 0.0  ;;  %v2208_v61 = vsel %vm2201_vm0, %v2187_v20, 0.0  ;;  %v2205_v0 = vsel %vm2201_vm0, %v2186_v36, 0.0  ;;  %v2211_v44 = vsel %vm2201_vm0, %v2188_v50, 0.0 }
 0x29c   : > { %2203 = vadd.xlane.f32.xlu0 %v2202_v58  ;;  %2209 = vadd.xlane.f32.xlu1 %v2208_v61  ;;  %v2189_v13 = vsel %vm4116_vm1, %v2173_v11, 0.0  ;;  %v2190_v29 = vsel %vm4116_vm1, %v2174_v21, 0.0  ;;  %v2191_v3 = vsel %vm4116_vm1, %v2175_v25, 0.0  ;;  %v2192_v38 = vsel %vm4116_vm1, %v2176_v48, 0.0 }
 0x29d   : > { %2924 = vmatpush3.bf16.msra.mxu0 %v3323_v55  ;;  %v2214_v34 = vsel %vm2201_vm0, %v2189_v13, 0.0  ;;  %v2217_v30 = vsel %vm2201_vm0, %v2190_v29, 0.0  ;;  %v2220_v60 = vsel %vm2201_vm0, %v2191_v3, 0.0  ;;  %v2223_v39 = vsel %vm2201_vm0, %v2192_v38, 0.0  ;;  %v2182_v55 = vld [vmem:[%s3688_s26 + $0x68] sm:$0xff] }
 0x29e   : > { %2925 = vmatprep.subr.bf16.mxu0 %v3324_v49  ;;  %2956 = vmatpush3.bf16.msra.mxu1 %v3335_v5  ;;  %v2193_v16 = vsel %vm4116_vm1, %v2177_v33, 0.0  ;;  %v2194_v40 = vsel %vm4116_vm1, %v2178_v53, 0.0  ;;  %v2195_v27 = vsel %vm4116_vm1, %v2179_v43, 0.0  ;;  %v2196_v47 = vsel %vm4116_vm1, %v2180_v37, 0.0 }
 0x29f   : > { %2957 = vmatprep.subr.bf16.mxu1 %v3336_v9  ;;  %v2226_v24 = vsel %vm2201_vm0, %v2193_v16, 0.0  ;;  %v2229_v59 = vsel %vm2201_vm0, %v2194_v40, 0.0  ;;  %v2232_v1 = vsel %vm2201_vm0, %v2195_v27, 0.0  ;;  %v2235_v22 = vsel %vm2201_vm0, %v2196_v47, 0.0 }
 0x2a0   : > { %2206 = vadd.xlane.f32.xlu0 %v2205_v0  ;;  %2212 = vadd.xlane.f32.xlu1 %v2211_v44  ;;  %v2198_v5 = vsel %vm4116_vm1, %v2182_v55, 0.0 }
 0x2a1   : > { %2926 = vmatpush3.bf16.msra.mxu0 %v3324_v49  ;;  %v2197_v49 = vsel %vm4116_vm1, %v2181_v51, 0.0 }
 0x2a2   : > { %2927 = vmatprep.subr.bf16.mxu0 %v3325_v45  ;;  %2958 = vmatpush3.bf16.msra.mxu1 %v3336_v9  ;;  %v2238_v9 = vsel %vm2201_vm0, %v2197_v49, 0.0 }
 0x2a3   : > { %2959 = vmatprep.subr.bf16.mxu1 %v3339_v52 }
 0x2a4   : > { %2215 = vadd.xlane.f32.xlu0 %v2214_v34  ;;  %2218 = vadd.xlane.f32.xlu1 %v2217_v30 }
 0x2a5   : > { %2928 = vmatpush3.bf16.msra.mxu0 %v3325_v45  ;;  %v2183_v45 = vld [vmem:[%s3688_s26 + $0x70] sm:$0xff] }
 0x2a6   : > { %2929 = vmatprep.subr.bf16.mxu0 %v3327_v28  ;;  %2960 = vmatpush3.bf16.msra.mxu1 %v3339_v52  ;;  %v2241_v52 = vsel %vm2201_vm0, %v2198_v5, 0.0 }
 0x2a7   : > { %2961 = vmatprep.subr.bf16.mxu1 %v3340_v42 }
 0x2a8   : > { %2221 = vadd.xlane.f32.xlu0 %v2220_v60  ;;  %2224 = vadd.xlane.f32.xlu1 %v2223_v39 }
 0x2a9   : > { %2930 = vmatpush3.bf16.msra.mxu0 %v3327_v28  ;;  %v2184_v28 = vld [vmem:[%s3688_s26 + $0x78] sm:$0xff] }
 0x2aa   : > { %2962 = vmatpush3.bf16.msra.mxu1 %v3340_v42  ;;  %2979 = vmatprep.subr.bf16.mxu0 %v3343_v15 }
 0x2ab   : > { %3027 = vmatprep.subr.bf16.mxu1 %v3343_v15 }
 0x2ac   : > { %2932 = vmatmul.mubr.bf16.vlgmr.msra.gmra.mrb[0].mxu0 %v3330_v56  ;;  %2227 = vadd.xlane.f32.xlu0 %v2226_v24 }
 0x2ad   : > { %2935 = vmatprep.mubr.bf16.mxu0 %v3333_v4  ;;  %2964 = vmatmul.mubr.bf16.vlgmr.msra.gmra.mrb[0].mxu1 %v3330_v56  ;;  %v2199_v56 = vsel %vm4116_vm1, %v2183_v45, 0.0 }
 0x2ae   : > { %2967 = vmatprep.mubr.bf16.mxu1 %v3333_v4  ;;  %2980 = vmatpush3.bf16.msra.mxu0 %v3343_v15  ;;  %v2200_v4 = vsel %vm4116_vm1, %v2184_v28, 0.0  ;;  %v2244_v42 = vsel %vm2201_vm0, %v2199_v56, 0.0 }
 0x2af   : > { %3035 = vmatpush3.bf16.msra.mxu1 %v3343_v15  ;;  %2981 = vmatprep.subr.bf16.mxu0 %v3344_v31 }
 0x2b0   : > { %3028 = vmatprep.subr.bf16.mxu1 %v3344_v31  ;;  %2230 = vadd.xlane.f32.xlu1 %v2229_v59 }
 0x2b1   : > { %2233 = vadd.xlane.f32.xlu0 %v2232_v1 }
 0x2b2   : > { %2982 = vmatpush3.bf16.msra.mxu0 %v3344_v31 }
 0x2b3   : > { %3036 = vmatpush3.bf16.msra.mxu1 %v3344_v31  ;;  %2983 = vmatprep.subr.bf16.mxu0 %v3345_v54 }
 0x2b4   : > { %2936 = vmatmul.mubr.bf16.gmra.mrb[4].mxu0 %v3334_v23  ;;  %3029 = vmatprep.subr.bf16.mxu1 %v3345_v54 }
 0x2b5   : > { %2939 = vmatprep.mubr.bf16.mxu0 %v3337_v32  ;;  %2968 = vmatmul.mubr.bf16.gmra.mrb[4].mxu1 %v3334_v23  ;;  %v2247_v23 = vsel %vm2201_vm0, %v2200_v4, 0.0 }
 0x2b6   : > { %2971 = vmatprep.mubr.bf16.mxu1 %v3337_v32  ;;  %2984 = vmatpush3.bf16.msra.mxu0 %v3345_v54 }
 0x2b7   : > { %3037 = vmatpush3.bf16.msra.mxu1 %v3345_v54  ;;  %2985 = vmatprep.subr.bf16.mxu0 %v3346_v62 }
 0x2b8   : > { %3030 = vmatprep.subr.bf16.mxu1 %v3346_v62  ;;  %2236 = vadd.xlane.f32.xlu1 %v2235_v22 }
 0x2b9   : > { %2239 = vadd.xlane.f32.xlu0 %v2238_v9 }
 0x2ba   : > { %2986 = vmatpush3.bf16.msra.mxu0 %v3346_v62 }
 0x2bb   : > { %3038 = vmatpush3.bf16.msra.mxu1 %v3346_v62  ;;  %2987 = vmatprep.subr.bf16.mxu0 %v3347_v57 }
 0x2bc   : > { %2940 = vmatmul.mubr.bf16.gmra.mrb[8].mxu0 %v3338_v41  ;;  %3031 = vmatprep.subr.bf16.mxu1 %v3347_v57 }
 0x2bd   : > { %2943 = vmatprep.mubr.bf16.mxu0 %v3341_v8  ;;  %2972 = vmatmul.mubr.bf16.gmra.mrb[8].mxu1 %v3338_v41 }
 0x2be   : > { %2975 = vmatprep.mubr.bf16.mxu1 %v3341_v8  ;;  %2988 = vmatpush3.bf16.msra.mxu0 %v3347_v57 }
 0x2bf   : > { %3039 = vmatpush3.bf16.msra.mxu1 %v3347_v57  ;;  %2989 = vmatprep.subr.bf16.mxu0 %v3348_v7 }
 0x2c0   : > { %3032 = vmatprep.subr.bf16.mxu1 %v3348_v7  ;;  %2242 = vadd.xlane.f32.xlu1 %v2241_v52 }
 0x2c1   : > { %2245 = vadd.xlane.f32.xlu0 %v2244_v42 }
 0x2c2   : > { %2990 = vmatpush3.bf16.msra.mxu0 %v3348_v7 }
 0x2c3   : > { %3040 = vmatpush3.bf16.msra.mxu1 %v3348_v7  ;;  %2991 = vmatprep.subr.bf16.mxu0 %v3349_v63 }
 0x2c4   : > { %2944 = vmatmul.mubr.bf16.gmra.mrb[12].mxu0 %v3342_v12  ;;  %3033 = vmatprep.subr.bf16.mxu1 %v3349_v63 }
 0x2c5   : > { %2976 = vmatmul.mubr.bf16.gmra.mrb[12].mxu1 %v3342_v12  ;;  %2248 = vadd.xlane.f32.xlu1 %v2247_v23 }
 0x2c6   : > { %2992 = vmatpush3.bf16.msra.mxu0 %v3349_v63 }
 0x2c7   : > { %3041 = vmatpush3.bf16.msra.mxu1 %v3349_v63  ;;  %2993 = vmatprep.subr.bf16.mxu0 %v3350_v46 }
 0x2c8   : > { %3034 = vmatprep.subr.bf16.mxu1 %v3350_v46 }
 0x2ca   : > { %2994 = vmatpush3.bf16.msra.mxu0 %v3350_v46 }
 0x2cb   : > { %3042 = vmatpush3.bf16.msra.mxu1 %v3350_v46 }
 0x37f   : > { %v4180_v32 = vpop.f32.mrb[0].mxu0 }
 0x380   : > { %v2691_v41 = vmul.f32 -1.442695, %v4180_v32  ;;  %v4183_v8 = vpop.f32.mrb[1].mxu0  ;;  %v4192_v57 = vpop.f32.mrb[0].mxu1 }
 0x381   : > { %v2689_v12 = vmul.f32 -1.442695, %v4183_v8  ;;  %v4186_v15 = vpop.f32.mrb[2].mxu0  ;;  %v4196_v63 = vpop.f32.mrb[1].mxu1 }
 0x382   : > { %3351 = vpow2.f32 %v2691_v41  ;;  %v2692_v31 = vmul.f32 -1.442695, %v4186_v15  ;;  %v4189_v54 = vpop.f32.mrb[3].mxu0  ;;  %v4201_v2 = vpop.f32.mrb[2].mxu1 }
 0x383   : > { %3353 = vpow2.f32 %v2689_v12  ;;  %v2690_v62 = vmul.f32 -1.442695, %v4189_v54  ;;  %v4206_v6 = vpop.f32.mrb[3].mxu1 }
 0x384   : > { %3355 = vpow2.f32 %v2692_v31 }
 0x385   : > { %3357 = vpow2.f32 %v2690_v62 }
 0x387   : > { %v4194_v7 = vpop.f32.mrb[4].mxu0 }
 0x388   : > { %v2695_v46 = vmul.f32 -1.442695, %v4194_v7  ;;  %v4199_v10 = vpop.f32.mrb[5].mxu0  ;;  %v4212_v61 = vpop.f32.mrb[4].mxu1 }
 0x389   : > { %v2693_v14 = vmul.f32 -1.442695, %v4199_v10  ;;  %v4204_v19 = vpop.f32.mrb[6].mxu0  ;;  %v4216_v44 = vpop.f32.mrb[5].mxu1 }
 0x38a   : > { %3359 = vpow2.f32 %v2695_v46  ;;  %v2696_v18 = vmul.f32 -1.442695, %v4204_v19  ;;  %v4209_v26 = vpop.f32.mrb[7].mxu0  ;;  %v4221_v48 = vpop.f32.mrb[6].mxu1 }
 0x38b   : > { %3361 = vpow2.f32 %v2693_v14  ;;  %v2694_v17 = vmul.f32 -1.442695, %v4209_v26  ;;  %v4226_v3 = vpop.f32.mrb[7].mxu1 }
 0x38c   : > { %v3352_v35 = vpop.eup %3351  ;;  %3363 = vpow2.f32 %v2696_v18 }
 0x38d   : > { %v3354_v20 = vpop.eup %3353  ;;  %v1918_v36 = vadd.f32 1.0, %v3352_v35  ;;  %3365 = vpow2.f32 %v2694_v17 }
 0x38e   : > { %v3356_v50 = vpop.eup %3355  ;;  %v1916_v58 = vadd.f32 1.0, %v3354_v20 }
 0x38f   : > { %v3358_v11 = vpop.eup %3357  ;;  %3367 = vrcp.f32 %v1918_v36  ;;  %v1919_v21 = vadd.f32 1.0, %v3356_v50  ;;  %v4214_v0 = vpop.f32.mrb[8].mxu0 }
 0x390   : > { %3369 = vrcp.f32 %v1916_v58  ;;  %v1917_v13 = vadd.f32 1.0, %v3358_v11  ;;  %v2699_v29 = vmul.f32 -1.442695, %v4214_v0  ;;  %v4219_v25 = vpop.f32.mrb[9].mxu0  ;;  %v4232_v37 = vpop.f32.mrb[8].mxu1 }
 0x391   : > { %3371 = vrcp.f32 %v1919_v21  ;;  %v2697_v34 = vmul.f32 -1.442695, %v4219_v25  ;;  %v4224_v30 = vpop.f32.mrb[10].mxu0  ;;  %v4236_v47 = vpop.f32.mrb[9].mxu1 }
 0x392   : > { %3373 = vrcp.f32 %v1917_v13  ;;  %v2700_v38 = vmul.f32 -1.442695, %v4224_v30  ;;  %v4229_v33 = vpop.f32.mrb[11].mxu0  ;;  %v4241_v22 = vpop.f32.mrb[10].mxu1 }
 0x393   : > { %3375 = vpow2.f32 %v2699_v29  ;;  %v2698_v53 = vmul.f32 -1.442695, %v4229_v33  ;;  %v4246_v28 = vpop.f32.mrb[11].mxu1 }
 0x394   : > { %v3360_v60 = vpop.eup %3359  ;;  %3377 = vpow2.f32 %v2697_v34 }
 0x395   : > { %v3362_v39 = vpop.eup %3361  ;;  %v1922_v16 = vadd.f32 1.0, %v3360_v60  ;;  %3379 = vpow2.f32 %v2700_v38 }
 0x396   : > { %v3364_v40 = vpop.eup %3363  ;;  %v1920_v43 = vadd.f32 1.0, %v3362_v39  ;;  %3381 = vpow2.f32 %v2698_v53 }
 0x397   : > { %v3366_v24 = vpop.eup %3365  ;;  %3383 = vrcp.f32 %v1922_v16  ;;  %v1923_v59 = vadd.f32 1.0, %v3364_v40  ;;  %v4234_v27 = vpop.f32.mrb[12].mxu0 }
 0x398   : > { %3385 = vrcp.f32 %v1920_v43  ;;  %v1921_v51 = vadd.f32 1.0, %v3366_v24  ;;  %v2703_v55 = vmul.f32 -1.442695, %v4234_v27  ;;  %v4239_v1 = vpop.f32.mrb[13].mxu0  ;;  %v4259_v35 = vpop.f32.mrb[12].mxu1 }
 0x399   : > { %v3368_v49 = vpop.eup %3367  ;;  %3387 = vrcp.f32 %v1923_v59  ;;  %v2701_v5 = vmul.f32 -1.442695, %v4239_v1  ;;  %v4244_v45 = vpop.f32.mrb[14].mxu0 }
 0x39a   : > { %v3370_v9 = vpop.eup %3369  ;;  %v1966_v52 = vmul.f32 %v3368_v49, %v4180_v32  ;;  %3389 = vrcp.f32 %v1921_v51  ;;  %v2704_v56 = vmul.f32 -1.442695, %v4244_v45  ;;  %v4250_v4 = vpop.f32.mrb[15].mxu0 }
 0x39b   : > { %v3372_v42 = vpop.eup %3371  ;;  %v1964_v23 = vmul.f32 %v3370_v9, %v4183_v8  ;;  %3391 = vpow2.f32 %v2703_v55  ;;  %v2702_v41 = vmul.f32 -1.442695, %v4250_v4  ;;  %v4262_v50 = vpop.f32.mrb[13].mxu1 }
 0x39c   : > { %v3374_v12 = vpop.eup %3373  ;;  %v1967_v31 = vmul.f32 %v3372_v42, %v4186_v15  ;;  %3393 = vpow2.f32 %v2701_v5  ;;  %v1982_v62 = vmul.f32 %v4192_v57, %v1966_v52  ;;  %v4264_v11 = vpop.f32.mrb[14].mxu1 }
 0x39d   : > { %v3376_v46 = vpop.eup %3375  ;;  %v1965_v32 = vmul.f32 %v3374_v12, %v4189_v54  ;;  %3395 = vpow2.f32 %v2704_v56  ;;  %v1980_v14 = vmul.f32 %v1964_v23, %v4196_v63  ;;  %v1856_v29 = vpop.f32.mrb[15].mxu1 }
 0x39e   : > { %v3378_v18 = vpop.eup %3377  ;;  %v1926_v17 = vadd.f32 1.0, %v3376_v46  ;;  %3397 = vpow2.f32 %v2702_v41  ;;  %v1983_v8 = vmul.f32 %v4201_v2, %v1967_v31 }
 0x39f   : > { %v3380_v20 = vpop.eup %3379  ;;  %v1924_v36 = vadd.f32 1.0, %v3378_v18  ;;  %v1981_v15 = vmul.f32 %v1965_v32, %v4206_v6 }
 0x3a0   : > { %v3382_v57 = vpop.eup %3381  ;;  %3399 = vrcp.f32 %v1926_v17  ;;  %v1927_v58 = vadd.f32 1.0, %v3380_v20  ;;  %v1997_v54 = vpack.c.bf16 %v1983_v8, %v1982_v62 }
 0x3a1   : > { %v3384_v63 = vpop.eup %3383  ;;  %3401 = vrcp.f32 %v1924_v36  ;;  %v1925_v21 = vadd.f32 1.0, %v3382_v57  ;;  %v1996_v13 = vpack.c.bf16 %v1981_v15, %v1980_v14 }
 0x3a2   : > { %v3386_v2 = vpop.eup %3385  ;;  %v1970_v34 = vmul.f32 %v3384_v63, %v4194_v7  ;;  %3403 = vrcp.f32 %v1927_v58  ;;  %v2252_v63 = vld [vmem:[#allocation2 + $0x10] sm:$0xff] }
 0x3a3   : > { %v3388_v38 = vpop.eup %3387  ;;  %v1968_v6 = vmul.f32 %v3386_v2, %v4199_v10  ;;  %3405 = vrcp.f32 %v1925_v21  ;;  %2995 = vmatprep.mubr.bf16.mxu0 %v1996_v13  ;;  %v2250_v13 = vld [vmem:[#allocation2] sm:$0xff] }
 0x3a4   : > { %v3390_v53 = vpop.eup %3389  ;;  %v1971_v60 = vmul.f32 %v3388_v38, %v4204_v19  ;;  %v1986_v39 = vmul.f32 %v4212_v61, %v1970_v34  ;;  %2996 = vmatmul.mubr.bf16.vlgmr.msra.gmra.mrb[16].mxu0 %v1997_v54 }
 0x3a5   : > { %v3392_v16 = vpop.eup %3391  ;;  %v1969_v40 = vmul.f32 %v3390_v53, %v4209_v26  ;;  %v1984_v43 = vmul.f32 %v1968_v6, %v4216_v44  ;;  %v2251_v53 = vld [vmem:[#allocation2 + $0x8] sm:$0xff] }
 0x3a6   : > { %v3394_v24 = vpop.eup %3393  ;;  %v1930_v59 = vadd.f32 1.0, %v3392_v16  ;;  %v1987_v7 = vmul.f32 %v4221_v48, %v1971_v60 }
 0x3a7   : > { %v3396_v51 = vpop.eup %3395  ;;  %v1928_v55 = vadd.f32 1.0, %v3394_v24  ;;  %v1985_v10 = vmul.f32 %v1969_v40, %v4226_v3 }
 0x3a8   : > { %v3398_v49 = vpop.eup %3397  ;;  %3407 = vrcp.f32 %v1930_v59  ;;  %v1931_v5 = vadd.f32 1.0, %v3396_v51  ;;  %v1999_v19 = vpack.c.bf16 %v1987_v7, %v1986_v39  ;;  %v2256_v7 = vld [vmem:[#allocation2 + $0x30] sm:$0xff] }
 0x3a9   : > { %3409 = vrcp.f32 %v1928_v55  ;;  %v1929_v61 = vadd.f32 1.0, %v3398_v49  ;;  %v1998_v9 = vpack.c.bf16 %v1985_v10, %v1984_v43  ;;  %v2254_v10 = vld [vmem:[#allocation2 + $0x20] sm:$0xff] }
 0x3aa   : > { %v3400_v52 = vpop.eup %3399  ;;  %3411 = vrcp.f32 %v1931_v5 }
 0x3ab   : > { %v3402_v26 = vpop.eup %3401  ;;  %v1974_v44 = vmul.f32 %v3400_v52, %v4214_v0  ;;  %3413 = vrcp.f32 %v1929_v61  ;;  %2999 = vmatprep.mubr.bf16.mxu0 %v1998_v9 }
 0x3ac   : > { %v3404_v56 = vpop.eup %3403  ;;  %v1972_v48 = vmul.f32 %v3402_v26, %v4219_v25  ;;  %3000 = vmatmul.mubr.bf16.gmra.mrb[20].mxu0 %v1999_v19  ;;  %v2257_v19 = vld [vmem:[#allocation2 + $0x38] sm:$0xff]  ;;  %v2255_v26 = vld [vmem:[#allocation2 + $0x28] sm:$0xff] }
 0x3ad   : > { %v3406_v42 = vpop.eup %3405  ;;  %v1975_v3 = vmul.f32 %v3404_v56, %v4224_v30  ;;  %v1990_v23 = vmul.f32 %v4232_v37, %v1974_v44 }
 0x3ae   : > { %v1973_v41 = vmul.f32 %v3406_v42, %v4229_v33  ;;  %v1988_v12 = vmul.f32 %v1972_v48, %v4236_v47 }
 0x3af   : > { %v1991_v31 = vmul.f32 %v4241_v22, %v1975_v3 }
 0x3b0   : > { %v1989_v62 = vmul.f32 %v1973_v41, %v4246_v28 }
 0x3b1   : > { %v2001_v0 = vpack.c.bf16 %v1991_v31, %v1990_v23 }
 0x3b2   : > { %v3408_v46 = vpop.eup %3407  ;;  %v2000_v32 = vpack.c.bf16 %v1989_v62, %v1988_v12  ;;  %v2260_v12 = vld [vmem:[#allocation2 + $0x50] sm:$0xff] }
 0x3b3   : > { %v3410_v14 = vpop.eup %3409  ;;  %v1978_v25 = vmul.f32 %v3408_v46, %v4234_v27  ;;  %v2204_v27 = vpop.xlane.xlu0 %2203  ;;  %v2258_v46 = vld [vmem:[#allocation2 + $0x40] sm:$0xff] }
 0x3b4   : > { %v3412_v18 = vpop.eup %3411  ;;  %v1976_v17 = vmul.f32 %v3410_v14, %v4239_v1  ;;  %3003 = vmatprep.mubr.bf16.mxu1 %v2000_v32  ;;  %v2210_v1 = vpop.xlane.xlu1 %2209 }
 0x3b5   : > { %v3414_v30 = vpop.eup %3413  ;;  %v1979_v37 = vmul.f32 %v3412_v18, %v4244_v45  ;;  %v1994_v33 = vmul.f32 %v4259_v35, %v1978_v25  ;;  %3004 = vmatmul.mubr.bf16.vlgmr.msra.gmra.mrb[16].mxu1 %v2001_v0  ;;  %v2261_v25 = vld [vmem:[#allocation2 + $0x58] sm:$0xff] }
 0x3b6   : > { %v1977_v47 = vmul.f32 %v3414_v30, %v4250_v4  ;;  %v1992_v22 = vmul.f32 %v1976_v17, %v4262_v50 }
 0x3b7   : > { %v1995_v28 = vmul.f32 %v4264_v11, %v1979_v37  ;;  %v2207_v15 = vpop.xlane.xlu0 %2206 }
 0x3b8   : > { %v1993_v8 = vmul.f32 %v1977_v47, %v1856_v29  ;;  %v2213_v57 = vpop.xlane.xlu1 %2212  ;;  %v2253_v29 = vld [vmem:[#allocation2 + $0x18] sm:$0xff] }
 0x3b9   : > { %v2003_v20 = vpack.c.bf16 %v1995_v28, %v1994_v33  ;;  %v2259_v33 = vld [vmem:[#allocation2 + $0x48] sm:$0xff] }
 0x3ba   : > { %v2002_v36 = vpack.c.bf16 %v1993_v8, %v1992_v22 }
 0x3bb   : > { %v2216_v58 = vpop.xlane.xlu0 %2215 }
 0x3bc   : > { %3007 = vmatprep.mubr.bf16.mxu1 %v2002_v36  ;;  %v2219_v45 = vpop.xlane.xlu1 %2218 }
 0x3bd   : > { %3008 = vmatmul.mubr.bf16.gmra.mrb[20].mxu1 %v2003_v20 }
 0x3bf   : > { %v2222_v54 = vpop.xlane.xlu0 %2221 }
 0x3c0   : > { %v2225_v50 = vpop.xlane.xlu1 %2224 }
 0x3c3   : > { %v2228_v40 = vpop.xlane.xlu0 %2227 }
 0x3c4   : > { %v2231_v24 = vpop.xlane.xlu1 %2230 }
 0x3c7   : > { %v2234_v44 = vpop.xlane.xlu0 %2233 }
 0x3c8   : > { %v2237_v3 = vpop.xlane.xlu1 %2236 }
 0x3cb   : > { %v2240_v31 = vpop.xlane.xlu0 %2239 }
 0x3cc   : > { %v2243_v18 = vpop.xlane.xlu1 %2242 }
 0x3cf   : > { %v2246_v20 = vpop.xlane.xlu0 %2245 }
 0x477   : > { %v2997_v35 = vpop.f32.mrb[16].mxu0 }
 0x478   : > { %v2268_v21 = vmul.f32 %v2997_v35, %v2210_v1  ;;  %v2102_v4 = vpop.f32.mrb[17].mxu0  ;;  %v2249_v1 = vpop.xlane.xlu1 %2248  ;;  %v2265_v35 = vld [vmem:[#allocation2 + $0x78] sm:$0xff] }
 0x479   : > { %v2266_v2 = vmul.f32 %v2204_v27, %v2102_v4  ;;  %v2998_v11 = vpop.f32.mrb[18].mxu0  ;;  %v2264_v27 = vld [vmem:[#allocation2 + $0x70] sm:$0xff] }
 0x47a   : > { %v2284_v34 = vadd.f32 %v2268_v21, %v2252_v63  ;;  %v2269_v38 = vmul.f32 %v2998_v11, %v2213_v57  ;;  %v2105_v6 = vpop.f32.mrb[19].mxu0 }
 0x47b   : > { %v2282_v60 = vadd.f32 %v2266_v2, %v2250_v13  ;;  %v2267_v39 = vmul.f32 %v2207_v15, %v2105_v6  ;;  %v2263_v13 = vld [vmem:[#allocation2 + $0x68] sm:$0xff] }
 0x47c   : > { %2300 = vst [vmem:[#allocation2 + $0x10] sm:$0xff] %v2284_v34  ;;  %v2285_v16 = vadd.f32 %v2269_v38, %v2253_v29 }
 0x47d   : > { %2298 = vst [vmem:[#allocation2] sm:$0xff] %v2282_v60  ;;  %v2283_v43 = vadd.f32 %v2267_v39, %v2251_v53 }
 0x47e   : > { %2301 = vst [vmem:[#allocation2 + $0x18] sm:$0xff] %v2285_v16 }
 0x47f   : > { %2299 = vst [vmem:[#allocation2 + $0x8] sm:$0xff] %v2283_v43  ;;  %v3001_v59 = vpop.f32.mrb[20].mxu0 }
 0x480   : > { %v2272_v51 = vmul.f32 %v3001_v59, %v2222_v54  ;;  %v2118_v55 = vpop.f32.mrb[21].mxu0 }
 0x481   : > { %v2270_v49 = vmul.f32 %v2216_v58, %v2118_v55  ;;  %v3002_v5 = vpop.f32.mrb[22].mxu0  ;;  %v2262_v58 = vld [vmem:[#allocation2 + $0x60] sm:$0xff] }
 0x482   : > { %v2288_v61 = vadd.f32 %v2272_v51, %v2256_v7  ;;  %v2273_v9 = vmul.f32 %v3002_v5, %v2225_v50  ;;  %v2121_v52 = vpop.f32.mrb[23].mxu0 }
 0x483   : > { %v2286_v56 = vadd.f32 %v2270_v49, %v2254_v10  ;;  %v2271_v48 = vmul.f32 %v2219_v45, %v2121_v52 }
 0x484   : > { %2304 = vst [vmem:[#allocation2 + $0x30] sm:$0xff] %v2288_v61  ;;  %v2289_v42 = vadd.f32 %v2273_v9, %v2257_v19 }
 0x485   : > { %2302 = vst [vmem:[#allocation2 + $0x20] sm:$0xff] %v2286_v56  ;;  %v2287_v23 = vadd.f32 %v2271_v48, %v2255_v26 }
 0x486   : > { %2305 = vst [vmem:[#allocation2 + $0x38] sm:$0xff] %v2289_v42 }
 0x487   : > { %2303 = vst [vmem:[#allocation2 + $0x28] sm:$0xff] %v2287_v23 }
 0x488   : > { %v3005_v41 = vpop.f32.mrb[16].mxu1 }
 0x489   : > { %v2276_v62 = vmul.f32 %v3005_v41, %v2234_v44  ;;  %v2134_v0 = vpop.f32.mrb[17].mxu1 }
 0x48a   : > { %v2274_v32 = vmul.f32 %v2228_v40, %v2134_v0  ;;  %v3006_v14 = vpop.f32.mrb[18].mxu1 }
 0x48b   : > { %v2292_v17 = vadd.f32 %v2276_v62, %v2260_v12  ;;  %v2277_v30 = vmul.f32 %v3006_v14, %v2237_v3  ;;  %v2137_v37 = vpop.f32.mrb[19].mxu1 }
 0x48c   : > { %v2290_v47 = vadd.f32 %v2274_v32, %v2258_v46  ;;  %v2275_v22 = vmul.f32 %v2231_v24, %v2137_v37 }
 0x48d   : > { %2308 = vst [vmem:[#allocation2 + $0x50] sm:$0xff] %v2292_v17  ;;  %v2293_v28 = vadd.f32 %v2277_v30, %v2261_v25 }
 0x48e   : > { %2306 = vst [vmem:[#allocation2 + $0x40] sm:$0xff] %v2290_v47  ;;  %v2291_v8 = vadd.f32 %v2275_v22, %v2259_v33 }
 0x48f   : > { %2309 = vst [vmem:[#allocation2 + $0x58] sm:$0xff] %v2293_v28 }
 0x490   : > { %2307 = vst [vmem:[#allocation2 + $0x48] sm:$0xff] %v2291_v8  ;;  %v3009_v36 = vpop.f32.mrb[20].mxu1 }
 0x491   : > { %v2280_v15 = vmul.f32 %v3009_v36, %v2246_v20  ;;  %v2150_v57 = vpop.f32.mrb[21].mxu1 }
 0x492   : > { %v2278_v45 = vmul.f32 %v2240_v31, %v2150_v57  ;;  %v3010_v54 = vpop.f32.mrb[22].mxu1 }
 0x493   : > { %v2296_v63 = vadd.f32 %v2280_v15, %v2264_v27  ;;  %v2281_v21 = vmul.f32 %v3010_v54, %v2249_v1  ;;  %v2153_v4 = vpop.f32.mrb[23].mxu1 }
 0x494   : > { %v2294_v50 = vadd.f32 %v2278_v45, %v2262_v58  ;;  %v2279_v2 = vmul.f32 %v2243_v18, %v2153_v4 }
 0x495   : > { %2312 = vst [vmem:[#allocation2 + $0x70] sm:$0xff] %v2296_v63  ;;  %v2297_v11 = vadd.f32 %v2281_v21, %v2265_v35 }
 0x496   : > { %2310 = vst [vmem:[#allocation2 + $0x60] sm:$0xff] %v2294_v50  ;;  %v2295_v29 = vadd.f32 %v2279_v2, %v2263_v13 }
 0x497   : > { %2313 = vst [vmem:[#allocation2 + $0x78] sm:$0xff] %v2297_v11 }
 0x498   : > { %2311 = vst [vmem:[#allocation2 + $0x68] sm:$0xff] %v2295_v29 }
 0x499 PF: > { %p2713_p2 = scmp.ne.s32.totalorder %s3519_s24, 7 }
 0x49a   : > { %v2318_v34 = vld [vmem:[#allocation2] sm:$0xff] (!%p2713_p2)  ;;  %v2319_v38 = vld [vmem:[#allocation2 + $0x8] sm:$0xff] (!%p2713_p2)  ;;  %v2320_v6 = vld [vmem:[#allocation2 + $0x10] sm:$0xff] (!%p2713_p2) }
 0x49b   : > { %2317 = sbr.rel (%p2713_p2) target bundleno = 1187 (0x4a3), region = 64  ;;  %v2759_v53 = vpack.c.bf16 (!%p2713_p2), %v2319_v38, %v2318_v34  ;;  %v2321_v60 = vld [vmem:[#allocation2 + $0x18] sm:$0xff] (!%p2713_p2)  ;;  %v2322_v39 = vld [vmem:[#allocation2 + $0x20] sm:$0xff] (!%p2713_p2)  ;;  %v2323_v16 = vld [vmem:[#allocation2 + $0x28] sm:$0xff] (!%p2713_p2) }
 0x49c   : > { %v2764_v40 = vpack.c.bf16 (!%p2713_p2), %v2321_v60, %v2320_v6  ;;  %v2769_v43 = vpack.c.bf16 (!%p2713_p2), %v2323_v16, %v2322_v39  ;;  %v2324_v24 = vld [vmem:[#allocation2 + $0x30] sm:$0xff] (!%p2713_p2)  ;;  %v2325_v59 = vld [vmem:[#allocation2 + $0x38] sm:$0xff] (!%p2713_p2)  ;;  %v2326_v7 = vld [vmem:[#allocation2 + $0x40] sm:$0xff] (!%p2713_p2) }
 0x49d   : > { %2760 = vst [vmem:[%s3711_s28] sm:$0xff] (!%p2713_p2), %v2759_v53   ;;  %v2774_v51 = vpack.c.bf16 (!%p2713_p2), %v2325_v59, %v2324_v24  ;;  %v2327_v55 = vld [vmem:[#allocation2 + $0x48] sm:$0xff] (!%p2713_p2)  ;;  %v2328_v10 = vld [vmem:[#allocation2 + $0x50] sm:$0xff] (!%p2713_p2)  ;;  %v2329_v49 = vld [vmem:[#allocation2 + $0x58] sm:$0xff] (!%p2713_p2) }
 0x49e   : > { %2796 = vst [vmem:[%s3711_s28 + $0x8] sm:$0xff] (!%p2713_p2), %v2764_v40   ;;  %2797 = vst [vmem:[%s3711_s28 + $0x10] sm:$0xff] (!%p2713_p2), %v2769_v43   ;;  %v2779_v5 = vpack.c.bf16 (!%p2713_p2), %v2327_v55, %v2326_v7  ;;  %v2784_v19 = vpack.c.bf16 (!%p2713_p2), %v2329_v49, %v2328_v10  ;;  %v2330_v61 = vld [vmem:[#allocation2 + $0x60] sm:$0xff] (!%p2713_p2)  ;;  %v2332_v52 = vld [vmem:[#allocation2 + $0x70] sm:$0xff] (!%p2713_p2) }
 0x49f   : > { %v2331_v9 = vld [vmem:[#allocation2 + $0x68] sm:$0xff] (!%p2713_p2)  ;;  %2798 = vst [vmem:[%s3711_s28 + $0x18] sm:$0xff] (!%p2713_p2), %v2774_v51   ;;  %v2333_v44 = vld [vmem:[#allocation2 + $0x78] sm:$0xff] (!%p2713_p2) }
 0x4a0   : > { %v2789_v26 = vpack.c.bf16 (!%p2713_p2), %v2331_v9, %v2330_v61  ;;  %2799 = vst [vmem:[%s3711_s28 + $0x20] sm:$0xff] (!%p2713_p2), %v2779_v5   ;;  %2800 = vst [vmem:[%s3711_s28 + $0x28] sm:$0xff] (!%p2713_p2), %v2784_v19   ;;  %v2794_v56 = vpack.c.bf16 (!%p2713_p2), %v2333_v44, %v2332_v52 }
 0x4a2   : > { %2801 = vst [vmem:[%s3711_s28 + $0x30] sm:$0xff] %v2789_v26   ;;  %2802 = vst [vmem:[%s3711_s28 + $0x38] sm:$0xff] %v2794_v56  }
 0x4a3 PF: > { %s2755_s1 = sshll.u32 %s3523_s25, 10  ;;  %s2428_s27 = sshll.u32 %s3711_s28, 4  ;;  %s4305_s27 = int_to_ptr.vmem [resolvable:$true] %s2428_s27 }
 0x4a4   : > { %s4302_s17 = scalar_lea.hbm %s4370_s10, %s2755_s1  ;;  %s4398_s15 = sand.u32 1, %s3511_s22  }
 0x4a5   : > { %s4309_s14 = scalar_lea.sflag [#allocation7], %s4398_s15  ;;  %s3439_s20 = scalar_lea.vmem %s4305_s27, 1024 }
 0x4a6   : > { %p3440_p3 = scmp.ne.s32.totalorder %s4305_s27, %s3439_s20  ;;  %s3540_s25 = smov [#allocation6]  }
 0x4a7   : > { %s3443_s19 = sshll.u32 %s3540_s25, 4  ;;  %s3444_s19 = int_to_ptr.vmem [resolvable:$false] %s3443_s19 }
 0x4a8   : > { %p3441_p4 = pnand %p3440_p3, %p3653_p13  ;;  %s3445_s30 = scalar_lea.vmem %s3444_s19, 2048 }
 0x4a9   : > { %p3446_p7 = scmp.lt.s32.totalorder %s4305_s27, %s3444_s19  ;;  %p3447_p8 = scmp.lt.s32.totalorder %s3445_s30, %s3439_s20 }
 0x4aa   : > { %p3442_p6 = pneg %p3441_p4 }
 0x4ab   : > { %p3448_p9 = por %p3447_p8, %p3446_p7 }
 0x4ad   : > { %p3449_p10 = pnand %p3448_p9, %p3442_p6 }
 0x4af   : > { %3452 = shalt.err (!%p3449_p10)
}
 0x4b0   : > { %s3453_s28 = scalar_lea.hbm %s4302_s17, 1024  ;;  %s3457_s29 = scalar_lea.hbm %s4370_s10, 2048 }
 0x4b1   : > { %p3454_p11 = scmp.ne.s32.totalorder %s4302_s17, %s3453_s28  ;;  %p3458_p1 = scmp.lt.u32.totalorder %s4302_s17, %s4370_s10 }
 0x4b2   : > { %p3459_p2 = scmp.lt.u32.totalorder %s3457_s29, %s3453_s28  ;;  %p3461_p4 = scmp.lt.u32.totalorder %s3453_s28, %s4302_s17 }
 0x4b3   : > { %p3455_p12 = pnand %p3454_p11, %p3653_p13 }
 0x4b4   : > { %p3460_p3 = por %p3459_p2, %p3458_p1 }
 0x4b5   : > { %p3456_p0 = pneg %p3455_p12 }
 0x4b6   : > { %p3462_p6 = por %p3461_p4, %p3460_p3 }
 0x4b8   : > { %p3463_p7 = pnand %p3462_p6, %p3456_p0 }
 0x4ba   : > { %3466 = shalt.err (!%p3463_p7)
}
 0x4bb   : > { %s3541_s23 = smov 64   ;;  %s3542_s21 = smov 4  }
 0x4bc   : > { %3043 = dma.vmem_to_hbm [thread:$0]  (%p3653_p13), %s4305_s27, 1024, %s4302_s17, %s4309_s14, %s3541_s23, %s3541_s23, %s3542_s21  }
 0x4bd PF: > { %s4399_s2 = sld [smem:[#allocation14_spill]]  ;;  %s4400_s3 = sld [smem:[#allocation10_spill]] }
 0x4c3   : > { %p3049_p8 = scmp.ge.s32.totalorder %s4399_s2, 2  ;;  %s2443_s1 = sand.u32 1, %s4400_s3  }
 0x4c4   : > { %s2444_s24 = scalar_lea.sflag [#allocation7], %s2443_s1 }
 0x4c5   : > { %p3046_p9 = pnand %p3049_p8, %p3663_p5 }
 0x4c7   : > { %3502 = dma.done.wait (!%p3046_p9), %s2444_s24, 1024  }
 0x4c8   : > { %3504 = vsyncadd (!%p3046_p9), %s2444_s24, 4294966272  ;;  %s33_s28 = sadd.s32 1, %s4399_s2   ;;  %s4402_s26 = sld [smem:[#allocation11_spill]] }
 0x4c9   : > { %p30_p10 = scmp.ge.s32.totalorder %s33_s28, 18   ;;  %s4403_s23 = sld [smem:[#allocation18_spill]] }
 0x4ca   : > { %s4404_s24 = sld [smem:[#allocation12_spill]]  ;;  %s4405_s25 = sld [smem:[#allocation13_spill]] }
 0x4cb   : > { %s4406_s13 = sld [smem:[#allocation15_spill]]  ;;  %s4407_s27 = sld [smem:[#allocation16_spill]] }
 0x4cc   : > { %s4408_s1 = smov %s3511_s22  ;;  %32 = sbr.rel (!%p30_p10) target bundleno = 31 (0x1f), region = 111 }
 0x4ce   : > { %s4409_s22 = smov %s4402_s26 }
 0x4d1   : > { %s4410_s26 = smov %s4406_s13 }
 0x4d3   :  { %2449 = vsyncpa [#allocation7], 1 }
 0x4d4   :  { %2451 = vsyncpa [#allocation7 + $0x1], 1 }

</bundles_post_ra>
